<compile_context>
chip_gen: v6e
topology: v6e:2x2x1
jax: 0.10.0
libtpu: 0.0.40
codegen_flags: <defaults>
</compile_context>

<pallas_src>
import functools
import math

import jax
import jax.numpy as jnp
from jax.experimental import pallas as pl
from jax.experimental.pallas import tpu as pltpu

_BF16 = jnp.bfloat16
_F32 = jnp.float32


# ----------------------------- in-kernel helpers (fp32 element-wise) ----------
def _layernorm(x, eps=1e-6):
    mu = jnp.mean(x, axis=-1, keepdims=True)
    xc = x - mu
    var = jnp.mean(xc * xc, axis=-1, keepdims=True)
    return xc * jax.lax.rsqrt(var + eps)


def _gelu_tanh(x):
    c = math.sqrt(2.0 / math.pi)
    return 0.5 * x * (1.0 + jnp.tanh(c * (x + 0.044715 * x * x * x)))


# --------------------------------- kernel ------------------------------------
def adaln_selfattn_kernel(
    # inputs
    feat_full_ref,   # (L, C)      bf16 full current-scale features (KV build only)
    feat_ref,        # (tile_l, C) f32  per-tile features (residual path)
    prev_ref,        # (pL, C)     bf16 previous-scale context (raw, no modulation)
    mod_ref,         # (6, C)      f32  [gamma1, gamma2, scale1, scale2, shift1, shift2]
    scale_ref,       # (1, C)      f32  per-head attn scale, lane-dense broadcast
    ones_ref,        # (C, C)      bf16 block-diagonal head mask (per-head ssq matmul)
    wq_ref, bq_ref, wk_ref, wv_ref, bv_ref, wp_ref, bp_ref,   # attention weights
    w1_ref, b1_ref, w2_ref, b2_ref,                           # FFN weights
    # output
    out_ref,         # (tile_l, C)
    # scratch (persist across grid steps)
    x1_scr,          # (L, C) bf16  cached modulated-LN features (Q / current-K input)
    k_scr,           # (T, C) bf16  l2-normalized keys
    v_scr,           # (T, C) bf16  values
    *, num_heads, head_dim, prev_len, tile_l,
):
    lt = pl.program_id(1)

    mod = mod_ref[...]                                    # (6, C) f32
    gamma1, gamma2 = mod[0:1], mod[1:2]
    scale1, scale2 = mod[2:3], mod[3:4]
    shift1, shift2 = mod[4:5], mod[5:6]
    ones_blk = ones_ref[...]                              # (C, C) bf16

    def l2norm_full(x):
        # Full-width per-head l2 normalization: one MXU matmul with a block-diagonal
        # ones matrix broadcasts each head's sum-of-squares to all of its lanes, then
        # a dense VPU rsqrt-mul.  No per-head lane slices, no masked stores.
        ssq = jnp.dot((x * x).astype(_BF16), ones_blk, preferred_element_type=_F32)
        return x * jax.lax.rsqrt(jnp.maximum(ssq, 1e-24))  # matches F.normalize eps=1e-12

    # ---- once per batch (first L tile): build x1 cache and K / V for full context ----
    @pl.when(lt == 0)
    def _build_kv():
        featf = feat_full_ref[...].astype(_F32)                      # (L, C)
        x1f = _layernorm(featf) * (scale1 + 1.0) + shift1            # modulated LN
        x1b = x1f.astype(_BF16)
        x1_scr[...] = x1b                                            # dense full store

        prev = prev_ref[...]                                         # (pL, C) bf16
        wk = wk_ref[...]
        wv = wv_ref[...]
        bv = bv_ref[...]
        # prev and current projected separately -> no (T, C) concat materialized.
        kp = jnp.dot(prev, wk, preferred_element_type=_F32)          # (pL, C) f32
        kc = jnp.dot(x1b, wk, preferred_element_type=_F32)           # (L, C)  f32
        # NOTE: if prev_len is not a multiple of 16 these become sublane-masked
        # (correct, slightly slower); pad prev_len in the caller for production.
        k_scr[:prev_len, :] = l2norm_full(kp).astype(k_scr.dtype)    # one dense store
        k_scr[prev_len:, :] = l2norm_full(kc).astype(k_scr.dtype)    # one dense store

        vp = jnp.dot(prev, wv, preferred_element_type=_F32) + bv
        vc = jnp.dot(x1b, wv, preferred_element_type=_F32) + bv
        v_scr[:prev_len, :] = vp.astype(v_scr.dtype)
        v_scr[prev_len:, :] = vc.astype(v_scr.dtype)

    # ----------------------------- per-tile work ------------------------------
    row0 = pl.multiple_of(lt * tile_l, tile_l)
    feat = feat_ref[...].astype(_F32)                                # (tile_l, C) f32
    x1_t = x1_scr[pl.ds(row0, tile_l), :]                            # (tile_l, C) bf16

    q = jnp.dot(x1_t, wq_ref[...], preferred_element_type=_F32) + bq_ref[...]
    q_n = (l2norm_full(q) * scale_ref[...]).astype(_BF16)            # (tile_l, C) bf16

    C = q.shape[-1]
    acc = jnp.zeros((tile_l, C), _F32)
    # TODO(synk): for production context lengths (T in the thousands) replace this
    # unrolled head loop with lax.fori_loop + T-chunked online softmax to bound live
    # ranges / spills.
    for h in range(num_heads):                                       # static head loop
        sl = slice(h * head_dim, (h + 1) * head_dim)
        # (tile_l, hd) x (T, hd)^T  -- contraction on the head dim (flash-attn pattern)
        s = jax.lax.dot_general(q_n[:, sl], k_scr[:, sl],
                                (((1,), (1,)), ((), ())),
                                preferred_element_type=_F32)         # (tile_l, T), scale=1
        s = s - jnp.max(s, axis=-1, keepdims=True)
        p = jnp.exp(s)
        p = p * pl.reciprocal(jnp.sum(p, axis=-1, keepdims=True), approx=True)
        o_h = jnp.dot(p.astype(_BF16), v_scr[:, sl],
                      preferred_element_type=_F32)                   # (tile_l, hd) f32
        # Accumulate the output projection per head: no head-output slab in VMEM,
        # no sub-128-lane masked stores, no bf16 round-trip of the attention output.
        acc = acc + jnp.dot(o_h.astype(_BF16), wp_ref[sl, :],
                            preferred_element_type=_F32)             # (tile_l, C)

    feat = feat + (acc + bp_ref[...]) * gamma1                       # residual 1

    # FFN branch
    x2 = _layernorm(feat) * (scale2 + 1.0) + shift2
    h1 = jnp.dot(x2.astype(_BF16), w1_ref[...],
                 preferred_element_type=_F32) + b1_ref[...]
    h1 = _gelu_tanh(h1)
    ffn = jnp.dot(h1.astype(_BF16), w2_ref[...],
                  preferred_element_type=_F32) + b2_ref[...]
    out_ref[...] = (feat + ffn * gamma2).astype(out_ref.dtype)       # residual 2


# --------------------------------- wrapper -----------------------------------
def adaln_selfattn(feat, prev_feat, cond_BD, params, *, num_heads, tile_l=None):
    B, L, C = feat.shape
    pL = prev_feat.shape[1]
    if pL == 0:
        # TODO(synk): pL == 0 (first VAR scale, no previous context) path not implemented.
        raise NotImplementedError("prev_feat with zero length is not supported")
    if cond_BD.shape[1] != 1:
        # TODO(synk): cond_len > 1 broadcasting is not plumbed.
        raise NotImplementedError("cond_len != 1 is not supported")
    head_dim = C // num_heads
    hidden = params["w1"].shape[1]
    T = pL + L

    # tile_l: target 256/128 (MXU fill), never below 16; single tile allowed for small L.
    if tile_l is None:
        tile_l = L
        for cand in (256, 128, 64, 32, 16):
            if L % cand == 0:
                tile_l = cand
                break
    assert L % tile_l == 0
    assert tile_l == L or tile_l % 16 == 0   # bf16 sublane packing for x1_scr slicing
    n_lt = L // tile_l

    # ---- hoisted glue (plain XLA, O(B*6C)): ada_lin + per-head scale + head mask ----
    ada = (jax.nn.silu(cond_BD.astype(_F32)) @ params["ada_w"].astype(_F32)
           + params["ada_b"].astype(_F32))                       # (B, 1, 6C)
    mod = ada.reshape(B, 6, C)                                   # [g1, g2, s1, s2, sh1, sh2]
    scale_vec = jnp.repeat(params["scale_mul"].astype(_F32), head_dim, axis=1)  # (1, C)
    head_ids = jnp.arange(C, dtype=jnp.int32) // head_dim
    ones_blk = (head_ids[:, None] == head_ids[None, :]).astype(_BF16)           # (C, C)

    # bf16 feeds the MXU; biases stay f32 (added to f32 accumulators).
    feat_bf = feat.astype(_BF16)            # KV-build copy only; residual path stays f32
    prev_bf = prev_feat.astype(_BF16)       # prev is only ever an MXU operand
    wq = params["wq"].astype(_BF16); wk = params["wk"].astype(_BF16)
    wv = params["wv"].astype(_BF16); wp = params["wp"].astype(_BF16)
    w1 = params["w1"].astype(_BF16); w2 = params["w2"].astype(_BF16)
    bq = params["bq"].astype(_F32); bv = params["bv"].astype(_F32)
    bp = params["bp"].astype(_F32); b1 = params["b1"].astype(_F32)
    b2 = params["b2"].astype(_F32)

    kernel = functools.partial(adaln_selfattn_kernel, num_heads=num_heads,
                               head_dim=head_dim, prev_len=pL, tile_l=tile_l)

    scratch_shapes = [
        pltpu.VMEM((L, C), _BF16),        # x1 cache (modulated LN features)
        pltpu.VMEM((T, C), _BF16),        # K (l2-normalized)
        pltpu.VMEM((T, C), _BF16),        # V
    ]

    # ---- cost / VMEM estimates ----
    weight_bytes = 2 * (5 * C * C + 2 * C * hidden)           # bf16 weights + ones_blk
    bias_bytes = 4 * (5 * C + hidden)                         # f32 biases + scale_vec
    scratch_bytes = 2 * (2 * T * C + L * C)
    block_bytes = (2 * L * C * 2 + 2 * pL * C * 2 + 2 * 6 * C * 4
                   + 4 * tile_l * C * 4)                      # pipelined activation blocks
    live_bytes = 4 * (tile_l * (T + 2 * C + hidden) + 3 * max(L, pL) * C)
    resident = weight_bytes + bias_bytes + scratch_bytes + block_bytes + live_bytes

    flops = int(B * (4 * T * C * C + 4 * L * C * C + 2 * (T + L) * C * C
                     + 4 * L * T * C + 4 * L * C * hidden))
    transcendentals = int(B * (num_heads * L * T + L * hidden))
    bytes_accessed = int(B * L * C * (2 + 4 + 4) + B * pL * C * 2 + B * 6 * C * 4
                         + weight_bytes + bias_bytes)

    # Generation-aware VMEM ceiling: ~0.8 * capacity (headroom for Mosaic scratch);
    # ~51 MiB on v7x (64 MiB/TC), ~102 MiB on v5e/v6e (128 MiB).
    try:
        vmem_cap = int(pltpu.get_tpu_info().vmem_capacity_bytes)
    except Exception:
        vmem_cap = 64 * 2 ** 20
    vmem_limit = int(min(max(int(1.5 * resident), 32 * 2 ** 20), int(0.8 * vmem_cap)))

    # Weights / constants: whole-array VMEM residency (single-buffered, no pipelining).
    vmem_const = pl.BlockSpec(memory_space=pltpu.MemorySpace.VMEM)

    in_specs = [
        pl.BlockSpec((None, L, C), lambda b, lt: (b, 0, 0)),         # feat (bf16, KV build)
        pl.BlockSpec((None, tile_l, C), lambda b, lt: (b, lt, 0)),   # feat (f32, per tile)
        pl.BlockSpec((None, pL, C), lambda b, lt: (b, 0, 0)),        # prev_feat (bf16)
        pl.BlockSpec((None, 6, C), lambda b, lt: (b, 0, 0)),         # modulation (ada_lin)
        vmem_const,                                                  # scale_vec
        vmem_const,                                                  # ones_blk
        vmem_const, vmem_const,                                      # wq, bq
        vmem_const,                                                  # wk (no bias)
        vmem_const, vmem_const,                                      # wv, bv
        vmem_const, vmem_const,                                      # wp, bp
        vmem_const, vmem_const,                                      # w1, b1
        vmem_const, vmem_const,                                      # w2, b2
    ]
    out_specs = pl.BlockSpec((None, tile_l, C), lambda b, lt: (b, lt, 0))

    call = pl.pallas_call(
        kernel,
        out_shape=jax.ShapeDtypeStruct((B, L, C), feat.dtype),
        grid_spec=pltpu.PrefetchScalarGridSpec(
            num_scalar_prefetch=0,
            grid=(B, n_lt),
            in_specs=in_specs,
            out_specs=out_specs,
            scratch_shapes=scratch_shapes,
        ),
        compiler_params=pltpu.CompilerParams(
            dimension_semantics=("parallel", "arbitrary"),
            vmem_limit_bytes=vmem_limit,
        ),
        cost_estimate=pl.CostEstimate(flops=flops,
                                      transcendentals=transcendentals,
                                      bytes_accessed=bytes_accessed),
    )
    return call(feat_bf, feat, prev_bf, mod, scale_vec, ones_blk,
                wq, bq, wk, wv, bv, wp, bp, w1, b1, w2, b2)


# --------------------------- pure-JAX fp32 reference --------------------------
def reference_forward(feat, prev_feat, cond_BD, params, *, num_heads):
    B, L, C = feat.shape
    H, hd = num_heads, C // num_heads

    def ln(x):
        mu = jnp.mean(x, -1, keepdims=True)
        var = jnp.mean((x - mu) ** 2, -1, keepdims=True)
        return (x - mu) / jnp.sqrt(var + 1e-6)

    def l2n(x):
        n = jnp.sqrt(jnp.sum(x * x, -1, keepdims=True))
        return x / jnp.maximum(n, 1e-12)

    ada = jax.nn.silu(cond_BD) @ params["ada_w"] + params["ada_b"][0]
    g1, g2, s1, s2, sh1, sh2 = [ada[..., i * C:(i + 1) * C] for i in range(6)]

    x1 = ln(feat) * (s1 + 1.0) + sh1
    q = x1 @ params["wq"] + params["bq"][0]
    kv = jnp.concatenate([prev_feat, x1], axis=1)
    k = kv @ params["wk"]
    v = kv @ params["wv"] + params["bv"][0]
    T = kv.shape[1]
    qh = q.reshape(B, L, H, hd).transpose(0, 2, 1, 3)
    kh = k.reshape(B, T, H, hd).transpose(0, 2, 1, 3)
    vh = v.reshape(B, T, H, hd).transpose(0, 2, 1, 3)
    qh = l2n(qh) * params["scale_mul"][0].reshape(1, H, 1, 1)
    kh = l2n(kh)
    s = jnp.einsum("bhld,bhtd->bhlt", qh, kh)          # scale = 1
    p = jax.nn.softmax(s, axis=-1)
    o = jnp.einsum("bhlt,bhtd->bhld", p, vh).transpose(0, 2, 1, 3).reshape(B, L, C)
    o = o @ params["wp"] + params["bp"][0]
    feat = feat + o * g1

    x2 = ln(feat) * (s2 + 1.0) + sh2
    h = jax.nn.gelu(x2 @ params["w1"] + params["b1"][0], approximate=True)
    f = h @ params["w2"] + params["b2"][0]
    return feat + f * g2


# ----------------------------------- main -------------------------------------
if __name__ == "__main__":
    B, L, pL = 2, 32, 16
    C, D = 128, 64            # embed_dim (lane-dense multiple of 128), cond_dim
    H = 4                     # num_heads -> head_dim = 32
    mlp_ratio = 4.0
    hidden = round(C * mlp_ratio)
    cond_len = 1

    key = jax.random.PRNGKey(0)
    ks = jax.random.split(key, 16)

    def w(k, shape, scale=0.02):
        return jax.random.normal(k, shape, jnp.float32) * scale

    # scale_mul_1H11 param init log(4); clamp_max(log 100) then exp -> done here (glue).
    scale_mul_param = jnp.full((1, H), math.log(4.0), jnp.float32)
    scale_mul = jnp.exp(jnp.minimum(scale_mul_param, math.log(100.0)))

    params = {
        "ada_w": w(ks[0], (D, 6 * C)),
        "ada_b": w(ks[1], (1, 6 * C)),
        "wq": w(ks[2], (C, C)), "bq": w(ks[3], (1, C)),
        "wk": w(ks[4], (C, C)),
        "wv": w(ks[5], (C, C)), "bv": w(ks[6], (1, C)),
        "wp": w(ks[7], (C, C)), "bp": w(ks[8], (1, C)),
        "scale_mul": scale_mul,
        "w1": w(ks[9], (C, hidden)), "b1": w(ks[10], (1, hidden)),
        "w2": w(ks[11], (hidden, C)), "b2": w(ks[12], (1, C)),
    }

    feat = jax.random.normal(ks[13], (B, L, C), jnp.float32)
    prev_feat = jax.random.normal(ks[14], (B, pL, C), jnp.float32)
    cond_BD = jax.random.normal(ks[15], (B, cond_len, D), jnp.float32)

    # tile_l=16 here only to exercise the multi-tile (n_lt=2) path at this tiny L;
    # production shapes auto-pick 128/256 via the wrapper.
    out = adaln_selfattn(feat, prev_feat, cond_BD, params, num_heads=H, tile_l=16)
    out = jax.block_until_ready(out)

    ref = reference_forward(feat, prev_feat, cond_BD, params, num_heads=H)
    assert out.shape == (B, L, C)
    # Tolerance reflects bf16 MXU operands (fp32 accumulation) vs the fp32 reference.
    assert jnp.allclose(out, ref, atol=1e-2, rtol=1e-2), (
        f"max abs diff {jnp.max(jnp.abs(out - ref))}")

    print("KERNEL_OK")
</pallas_src>

<mosaic_0001>
module attributes {stable_mosaic.version = 11 : i64} {
  func.func @adaln_selfattn_kernel(%arg0: i32, %arg1: i32, %arg2: memref<1x32x128xbf16, #tpu.memory_space<vmem>>, %arg3: memref<1x16x128xf32, #tpu.memory_space<vmem>>, %arg4: memref<1x16x128xbf16, #tpu.memory_space<vmem>>, %arg5: memref<1x6x128xf32, #tpu.memory_space<vmem>>, %arg6: memref<1x128xf32, #tpu.memory_space<vmem>>, %arg7: memref<128x128xbf16, #tpu.memory_space<vmem>>, %arg8: memref<128x128xbf16, #tpu.memory_space<vmem>>, %arg9: memref<1x128xf32, #tpu.memory_space<vmem>>, %arg10: memref<128x128xbf16, #tpu.memory_space<vmem>>, %arg11: memref<128x128xbf16, #tpu.memory_space<vmem>>, %arg12: memref<1x128xf32, #tpu.memory_space<vmem>>, %arg13: memref<128x128xbf16, #tpu.memory_space<vmem>>, %arg14: memref<1x128xf32, #tpu.memory_space<vmem>>, %arg15: memref<128x512xbf16, #tpu.memory_space<vmem>>, %arg16: memref<1x512xf32, #tpu.memory_space<vmem>>, %arg17: memref<512x128xbf16, #tpu.memory_space<vmem>>, %arg18: memref<1x128xf32, #tpu.memory_space<vmem>>, %arg19: memref<1x16x128xf32, #tpu.memory_space<vmem>>, %arg20: memref<32x128xbf16, #tpu.memory_space<vmem>>, %arg21: memref<48x128xbf16, #tpu.memory_space<vmem>>, %arg22: memref<48x128xbf16, #tpu.memory_space<vmem>>) attributes {dimension_semantics = [#tpu.dimension_semantics<parallel>, #tpu.dimension_semantics<arbitrary>], iteration_bounds = array<i64: 2, 2>, scalar_prefetch = 0 : i64, scratch_operands = 3 : i64, tpu.core_type = #tpu.core_type<tc>, window_params = [{transform_indices = @transform_0, window_bounds = array<i64: 1, 32, 128>}, {transform_indices = @transform_1, window_bounds = array<i64: 1, 16, 128>}, {transform_indices = @transform_2, window_bounds = array<i64: 1, 16, 128>}, {transform_indices = @transform_3, window_bounds = array<i64: 1, 6, 128>}, {pipeline_mode = #tpu.pipeline_mode<synchronous>, transform_indices = @transform_4, window_bounds = array<i64: 1, 128>}, {pipeline_mode = #tpu.pipeline_mode<synchronous>, transform_indices = @transform_5, window_bounds = array<i64: 128, 128>}, {pipeline_mode = #tpu.pipeline_mode<synchronous>, transform_indices = @transform_6, window_bounds = array<i64: 128, 128>}, {pipeline_mode = #tpu.pipeline_mode<synchronous>, transform_indices = @transform_7, window_bounds = array<i64: 1, 128>}, {pipeline_mode = #tpu.pipeline_mode<synchronous>, transform_indices = @transform_8, window_bounds = array<i64: 128, 128>}, {pipeline_mode = #tpu.pipeline_mode<synchronous>, transform_indices = @transform_9, window_bounds = array<i64: 128, 128>}, {pipeline_mode = #tpu.pipeline_mode<synchronous>, transform_indices = @transform_10, window_bounds = array<i64: 1, 128>}, {pipeline_mode = #tpu.pipeline_mode<synchronous>, transform_indices = @transform_11, window_bounds = array<i64: 128, 128>}, {pipeline_mode = #tpu.pipeline_mode<synchronous>, transform_indices = @transform_12, window_bounds = array<i64: 1, 128>}, {pipeline_mode = #tpu.pipeline_mode<synchronous>, transform_indices = @transform_13, window_bounds = array<i64: 128, 512>}, {pipeline_mode = #tpu.pipeline_mode<synchronous>, transform_indices = @transform_14, window_bounds = array<i64: 1, 512>}, {pipeline_mode = #tpu.pipeline_mode<synchronous>, transform_indices = @transform_15, window_bounds = array<i64: 512, 128>}, {pipeline_mode = #tpu.pipeline_mode<synchronous>, transform_indices = @transform_16, window_bounds = array<i64: 1, 128>}, {transform_indices = @transform_17, window_bounds = array<i64: 1, 16, 128>}]} {
    %c0 = arith.constant 0 : index
    %c0_0 = arith.constant 0 : index
    %c0_1 = arith.constant 0 : index
    %0 = vector.load %arg5[%c0, %c0_0, %c0_1] : memref<1x6x128xf32, #tpu.memory_space<vmem>>, vector<1x6x128xf32>
    %1 = vector.shape_cast %0 : vector<1x6x128xf32> to vector<6x128xf32>
    %2 = vector.extract_strided_slice %1 {offsets = [0, 0], sizes = [1, 128], strides = [1, 1]} : vector<6x128xf32> to vector<1x128xf32>
    %3 = vector.extract_strided_slice %1 {offsets = [1, 0], sizes = [1, 128], strides = [1, 1]} : vector<6x128xf32> to vector<1x128xf32>
    %4 = vector.extract_strided_slice %1 {offsets = [2, 0], sizes = [1, 128], strides = [1, 1]} : vector<6x128xf32> to vector<1x128xf32>
    %5 = vector.extract_strided_slice %1 {offsets = [3, 0], sizes = [1, 128], strides = [1, 1]} : vector<6x128xf32> to vector<1x128xf32>
    %6 = vector.extract_strided_slice %1 {offsets = [4, 0], sizes = [1, 128], strides = [1, 1]} : vector<6x128xf32> to vector<1x128xf32>
    %7 = vector.extract_strided_slice %1 {offsets = [5, 0], sizes = [1, 128], strides = [1, 1]} : vector<6x128xf32> to vector<1x128xf32>
    %c0_2 = arith.constant 0 : index
    %c0_3 = arith.constant 0 : index
    %8 = vector.load %arg7[%c0_2, %c0_3] : memref<128x128xbf16, #tpu.memory_space<vmem>>, vector<128x128xbf16>
    %c0_i32 = arith.constant 0 : i32
    %9 = arith.cmpi eq, %arg1, %c0_i32 : i32
    %10 = arith.extui %9 : i1 to i32
    %c0_i32_4 = arith.constant 0 : i32
    %11 = arith.cmpi ne, %10, %c0_i32_4 : i32
    scf.if %11 {
      %c0_84 = arith.constant 0 : index
      %c0_85 = arith.constant 0 : index
      %c0_86 = arith.constant 0 : index
      %174 = vector.load %arg2[%c0_84, %c0_85, %c0_86] : memref<1x32x128xbf16, #tpu.memory_space<vmem>>, vector<1x32x128xbf16>
      %175 = vector.shape_cast %174 : vector<1x32x128xbf16> to vector<32x128xbf16>
      %176 = arith.extf %175 : vector<32x128xbf16> to vector<32x128xf32>
      %cst_87 = arith.constant dense<0.000000e+00> : vector<32xf32>
      %177 = vector.multi_reduction <add>, %176, %cst_87 [1] : vector<32x128xf32> to vector<32xf32>
      %178 = vector.shape_cast %177 : vector<32xf32> to vector<32x1xf32>
      %cst_88 = arith.constant 1.280000e+02 : f32
      %179 = vector.broadcast %cst_88 : f32 to vector<32x1xf32>
      %180 = arith.divf %178, %179 : vector<32x1xf32>
      %181 = vector.broadcast %180 : vector<32x1xf32> to vector<32x128xf32>
      %182 = arith.subf %176, %181 : vector<32x128xf32>
      %183 = arith.mulf %182, %182 : vector<32x128xf32>
      %cst_89 = arith.constant dense<0.000000e+00> : vector<32xf32>
      %184 = vector.multi_reduction <add>, %183, %cst_89 [1] : vector<32x128xf32> to vector<32xf32>
      %185 = vector.shape_cast %184 : vector<32xf32> to vector<32x1xf32>
      %cst_90 = arith.constant 1.280000e+02 : f32
      %186 = vector.broadcast %cst_90 : f32 to vector<32x1xf32>
      %187 = arith.divf %185, %186 : vector<32x1xf32>
      %cst_91 = arith.constant 9.99999997E-7 : f32
      %188 = vector.broadcast %cst_91 : f32 to vector<32x1xf32>
      %189 = arith.addf %187, %188 : vector<32x1xf32>
      %190 = math.rsqrt %189 : vector<32x1xf32>
      %191 = vector.broadcast %190 : vector<32x1xf32> to vector<32x128xf32>
      %192 = arith.mulf %182, %191 : vector<32x128xf32>
      %cst_92 = arith.constant 1.000000e+00 : f32
      %193 = vector.broadcast %cst_92 : f32 to vector<1x128xf32>
      %194 = arith.addf %4, %193 : vector<1x128xf32>
      %195 = vector.broadcast %194 : vector<1x128xf32> to vector<32x128xf32>
      %196 = arith.mulf %192, %195 : vector<32x128xf32>
      %197 = vector.broadcast %6 : vector<1x128xf32> to vector<32x128xf32>
      %198 = arith.addf %196, %197 : vector<32x128xf32>
      %199 = arith.truncf %198 : vector<32x128xf32> to vector<32x128xbf16>
      %c0_93 = arith.constant 0 : index
      %c0_94 = arith.constant 0 : index
      %200 = vector.load %arg20[%c0_93, %c0_94] : memref<32x128xbf16, #tpu.memory_space<vmem>>, vector<32x128xbf16>
      tpu.vector_store %arg20[%c0_93, %c0_94], %199 {strides = array<i32>} : memref<32x128xbf16, #tpu.memory_space<vmem>>, vector<32x128xbf16>,
      %c0_95 = arith.constant 0 : index
      %c0_96 = arith.constant 0 : index
      %c0_97 = arith.constant 0 : index
      %201 = vector.load %arg4[%c0_95, %c0_96, %c0_97] : memref<1x16x128xbf16, #tpu.memory_space<vmem>>, vector<1x16x128xbf16>
      %202 = vector.shape_cast %201 : vector<1x16x128xbf16> to vector<16x128xbf16>
      %c0_98 = arith.constant 0 : index
      %c0_99 = arith.constant 0 : index
      %203 = vector.load %arg10[%c0_98, %c0_99] : memref<128x128xbf16, #tpu.memory_space<vmem>>, vector<128x128xbf16>
      %c0_100 = arith.constant 0 : index
      %c0_101 = arith.constant 0 : index
      %204 = vector.load %arg11[%c0_100, %c0_101] : memref<128x128xbf16, #tpu.memory_space<vmem>>, vector<128x128xbf16>
      %c0_102 = arith.constant 0 : index
      %c0_103 = arith.constant 0 : index
      %205 = vector.load %arg12[%c0_102, %c0_103] : memref<1x128xf32, #tpu.memory_space<vmem>>, vector<1x128xf32>
      %cst_104 = arith.constant dense<0.000000e+00> : vector<16x128xf32>
      %206 = tpu.matmul %202, %203, %cst_104 {dimension_numbers = #tpu.dot_dimension_numbers<[1], [0], [0], [1], [0, 0, 1, 1], [], []>} : vector<16x128xbf16>, vector<128x128xbf16>, vector<16x128xf32> -> vector<16x128xf32>
      %cst_105 = arith.constant dense<0.000000e+00> : vector<32x128xf32>
      %207 = tpu.matmul %199, %203, %cst_105 {dimension_numbers = #tpu.dot_dimension_numbers<[1], [0], [0], [1], [0, 0, 1, 1], [], []>} : vector<32x128xbf16>, vector<128x128xbf16>, vector<32x128xf32> -> vector<32x128xf32>
      %208 = arith.mulf %206, %206 : vector<16x128xf32>
      %209 = arith.truncf %208 : vector<16x128xf32> to vector<16x128xbf16>
      %cst_106 = arith.constant dense<0.000000e+00> : vector<16x128xf32>
      %210 = tpu.matmul %209, %8, %cst_106 {dimension_numbers = #tpu.dot_dimension_numbers<[1], [0], [0], [1], [0, 0, 1, 1], [], []>} : vector<16x128xbf16>, vector<128x128xbf16>, vector<16x128xf32> -> vector<16x128xf32>
      %cst_107 = arith.constant 1.000000e-24 : f32
      %211 = vector.broadcast %cst_107 : f32 to vector<16x128xf32>
      %212 = arith.maximumf %210, %211 : vector<16x128xf32>
      %213 = math.rsqrt %212 : vector<16x128xf32>
      %214 = arith.mulf %206, %213 : vector<16x128xf32>
      %215 = arith.truncf %214 : vector<16x128xf32> to vector<16x128xbf16>
      %c0_108 = arith.constant 0 : index
      %c0_109 = arith.constant 0 : index
      %216 = vector.load %arg21[%c0_108, %c0_109] : memref<48x128xbf16, #tpu.memory_space<vmem>>, vector<16x128xbf16>
      tpu.vector_store %arg21[%c0_108, %c0_109], %215 {strides = array<i32>} : memref<48x128xbf16, #tpu.memory_space<vmem>>, vector<16x128xbf16>,
      %217 = arith.mulf %207, %207 : vector<32x128xf32>
      %218 = arith.truncf %217 : vector<32x128xf32> to vector<32x128xbf16>
      %cst_110 = arith.constant dense<0.000000e+00> : vector<32x128xf32>
      %219 = tpu.matmul %218, %8, %cst_110 {dimension_numbers = #tpu.dot_dimension_numbers<[1], [0], [0], [1], [0, 0, 1, 1], [], []>} : vector<32x128xbf16>, vector<128x128xbf16>, vector<32x128xf32> -> vector<32x128xf32>
      %cst_111 = arith.constant 1.000000e-24 : f32
      %220 = vector.broadcast %cst_111 : f32 to vector<32x128xf32>
      %221 = arith.maximumf %219, %220 : vector<32x128xf32>
      %222 = math.rsqrt %221 : vector<32x128xf32>
      %223 = arith.mulf %207, %222 : vector<32x128xf32>
      %224 = arith.truncf %223 : vector<32x128xf32> to vector<32x128xbf16>
      %c16 = arith.constant 16 : index
      %c0_112 = arith.constant 0 : index
      %225 = vector.load %arg21[%c16, %c0_112] : memref<48x128xbf16, #tpu.memory_space<vmem>>, vector<32x128xbf16>
      tpu.vector_store %arg21[%c16, %c0_112], %224 {strides = array<i32>} : memref<48x128xbf16, #tpu.memory_space<vmem>>, vector<32x128xbf16>,
      %cst_113 = arith.constant dense<0.000000e+00> : vector<16x128xf32>
      %226 = tpu.matmul %202, %204, %cst_113 {dimension_numbers = #tpu.dot_dimension_numbers<[1], [0], [0], [1], [0, 0, 1, 1], [], []>} : vector<16x128xbf16>, vector<128x128xbf16>, vector<16x128xf32> -> vector<16x128xf32>
      %227 = vector.broadcast %205 : vector<1x128xf32> to vector<16x128xf32>
      %228 = arith.addf %226, %227 : vector<16x128xf32>
      %cst_114 = arith.constant dense<0.000000e+00> : vector<32x128xf32>
      %229 = tpu.matmul %199, %204, %cst_114 {dimension_numbers = #tpu.dot_dimension_numbers<[1], [0], [0], [1], [0, 0, 1, 1], [], []>} : vector<32x128xbf16>, vector<128x128xbf16>, vector<32x128xf32> -> vector<32x128xf32>
      %230 = vector.broadcast %205 : vector<1x128xf32> to vector<32x128xf32>
      %231 = arith.addf %229, %230 : vector<32x128xf32>
      %232 = arith.truncf %228 : vector<16x128xf32> to vector<16x128xbf16>
      %c0_115 = arith.constant 0 : index
      %c0_116 = arith.constant 0 : index
      %233 = vector.load %arg22[%c0_115, %c0_116] : memref<48x128xbf16, #tpu.memory_space<vmem>>, vector<16x128xbf16>
      tpu.vector_store %arg22[%c0_115, %c0_116], %232 {strides = array<i32>} : memref<48x128xbf16, #tpu.memory_space<vmem>>, vector<16x128xbf16>,
      %234 = arith.truncf %231 : vector<32x128xf32> to vector<32x128xbf16>
      %c16_117 = arith.constant 16 : index
      %c0_118 = arith.constant 0 : index
      %235 = vector.load %arg22[%c16_117, %c0_118] : memref<48x128xbf16, #tpu.memory_space<vmem>>, vector<32x128xbf16>
      tpu.vector_store %arg22[%c16_117, %c0_118], %234 {strides = array<i32>} : memref<48x128xbf16, #tpu.memory_space<vmem>>, vector<32x128xbf16>,
    } else {
    }
    %c16_i32 = arith.constant 16 : i32
    %12 = arith.muli %arg1, %c16_i32 : i32
    %13 = tpu.assume_multiple %12, 16 : i32
    %c0_5 = arith.constant 0 : index
    %c0_6 = arith.constant 0 : index
    %c0_7 = arith.constant 0 : index
    %14 = vector.load %arg3[%c0_5, %c0_6, %c0_7] : memref<1x16x128xf32, #tpu.memory_space<vmem>>, vector<1x16x128xf32>
    %15 = vector.shape_cast %14 : vector<1x16x128xf32> to vector<16x128xf32>
    %16 = arith.index_cast %13 : i32 to index
    %c0_8 = arith.constant 0 : index
    %17 = vector.load %arg20[%16, %c0_8] : memref<32x128xbf16, #tpu.memory_space<vmem>>, vector<16x128xbf16>
    %c0_9 = arith.constant 0 : index
    %c0_10 = arith.constant 0 : index
    %18 = vector.load %arg8[%c0_9, %c0_10] : memref<128x128xbf16, #tpu.memory_space<vmem>>, vector<128x128xbf16>
    %cst = arith.constant dense<0.000000e+00> : vector<16x128xf32>
    %19 = tpu.matmul %17, %18, %cst {dimension_numbers = #tpu.dot_dimension_numbers<[1], [0], [0], [1], [0, 0, 1, 1], [], []>} : vector<16x128xbf16>, vector<128x128xbf16>, vector<16x128xf32> -> vector<16x128xf32>
    %c0_11 = arith.constant 0 : index
    %c0_12 = arith.constant 0 : index
    %20 = vector.load %arg9[%c0_11, %c0_12] : memref<1x128xf32, #tpu.memory_space<vmem>>, vector<1x128xf32>
    %21 = vector.broadcast %20 : vector<1x128xf32> to vector<16x128xf32>
    %22 = arith.addf %19, %21 : vector<16x128xf32>
    %23 = arith.mulf %22, %22 : vector<16x128xf32>
    %24 = arith.truncf %23 : vector<16x128xf32> to vector<16x128xbf16>
    %cst_13 = arith.constant dense<0.000000e+00> : vector<16x128xf32>
    %25 = tpu.matmul %24, %8, %cst_13 {dimension_numbers = #tpu.dot_dimension_numbers<[1], [0], [0], [1], [0, 0, 1, 1], [], []>} : vector<16x128xbf16>, vector<128x128xbf16>, vector<16x128xf32> -> vector<16x128xf32>
    %cst_14 = arith.constant 1.000000e-24 : f32
    %26 = vector.broadcast %cst_14 : f32 to vector<16x128xf32>
    %27 = arith.maximumf %25, %26 : vector<16x128xf32>
    %28 = math.rsqrt %27 : vector<16x128xf32>
    %29 = arith.mulf %22, %28 : vector<16x128xf32>
    %c0_15 = arith.constant 0 : index
    %c0_16 = arith.constant 0 : index
    %30 = vector.load %arg6[%c0_15, %c0_16] : memref<1x128xf32, #tpu.memory_space<vmem>>, vector<1x128xf32>
    %31 = vector.broadcast %30 : vector<1x128xf32> to vector<16x128xf32>
    %32 = arith.mulf %29, %31 : vector<16x128xf32>
    %33 = arith.truncf %32 : vector<16x128xf32> to vector<16x128xbf16>
    %cst_17 = arith.constant 0.000000e+00 : f32
    %34 = vector.broadcast %cst_17 : f32 to vector<16x128xf32>
    %35 = vector.extract_strided_slice %33 {offsets = [0, 0], sizes = [16, 32], strides = [1, 1]} : vector<16x128xbf16> to vector<16x32xbf16>
    %c0_18 = arith.constant 0 : index
    %c0_19 = arith.constant 0 : index
    %36 = vector.load %arg21[%c0_18, %c0_19] : memref<48x128xbf16, #tpu.memory_space<vmem>>, vector<48x32xbf16>
    %cst_20 = arith.constant dense<0.000000e+00> : vector<16x48xf32>
    %37 = tpu.matmul %35, %36, %cst_20 {dimension_numbers = #tpu.dot_dimension_numbers<[1], [1], [0], [0], [0, 0, 1, 0], [], []>} : vector<16x32xbf16>, vector<48x32xbf16>, vector<16x48xf32> -> vector<16x48xf32>
    %cst_21 = arith.constant dense<0xFF800000> : vector<16xf32>
    %38 = vector.multi_reduction <maximumf>, %37, %cst_21 [1] : vector<16x48xf32> to vector<16xf32>
    %39 = vector.shape_cast %38 : vector<16xf32> to vector<16x1xf32>
    %40 = vector.broadcast %39 : vector<16x1xf32> to vector<16x48xf32>
    %41 = arith.subf %37, %40 : vector<16x48xf32>
    %42 = math.exp %41 : vector<16x48xf32>
    %cst_22 = arith.constant dense<0.000000e+00> : vector<16xf32>
    %43 = vector.multi_reduction <add>, %42, %cst_22 [1] : vector<16x48xf32> to vector<16xf32>
    %44 = vector.shape_cast %43 : vector<16xf32> to vector<16x1xf32>
    %45 = tpu.reciprocal %44 {approx = true} : vector<16x1xf32> -> vector<16x1xf32>
    %46 = vector.broadcast %45 : vector<16x1xf32> to vector<16x48xf32>
    %47 = arith.mulf %42, %46 : vector<16x48xf32>
    %48 = arith.truncf %47 : vector<16x48xf32> to vector<16x48xbf16>
    %c0_23 = arith.constant 0 : index
    %c0_24 = arith.constant 0 : index
    %49 = vector.load %arg22[%c0_23, %c0_24] : memref<48x128xbf16, #tpu.memory_space<vmem>>, vector<48x32xbf16>
    %cst_25 = arith.constant dense<0.000000e+00> : vector<16x32xf32>
    %50 = tpu.matmul %48, %49, %cst_25 {dimension_numbers = #tpu.dot_dimension_numbers<[1], [0], [0], [1], [0, 0, 1, 1], [], []>} : vector<16x48xbf16>, vector<48x32xbf16>, vector<16x32xf32> -> vector<16x32xf32>
    %51 = arith.truncf %50 : vector<16x32xf32> to vector<16x32xbf16>
    %c0_26 = arith.constant 0 : index
    %c0_27 = arith.constant 0 : index
    %52 = vector.load %arg13[%c0_26, %c0_27] : memref<128x128xbf16, #tpu.memory_space<vmem>>, vector<32x128xbf16>
    %cst_28 = arith.constant dense<0.000000e+00> : vector<16x128xf32>
    %53 = tpu.matmul %51, %52, %cst_28 {dimension_numbers = #tpu.dot_dimension_numbers<[1], [0], [0], [1], [0, 0, 1, 1], [], []>} : vector<16x32xbf16>, vector<32x128xbf16>, vector<16x128xf32> -> vector<16x128xf32>
    %54 = arith.addf %34, %53 : vector<16x128xf32>
    %55 = vector.extract_strided_slice %33 {offsets = [0, 32], sizes = [16, 32], strides = [1, 1]} : vector<16x128xbf16> to vector<16x32xbf16>
    %c0_29 = arith.constant 0 : index
    %c32 = arith.constant 32 : index
    %56 = vector.load %arg21[%c0_29, %c32] : memref<48x128xbf16, #tpu.memory_space<vmem>>, vector<48x32xbf16>
    %cst_30 = arith.constant dense<0.000000e+00> : vector<16x48xf32>
    %57 = tpu.matmul %55, %56, %cst_30 {dimension_numbers = #tpu.dot_dimension_numbers<[1], [1], [0], [0], [0, 0, 1, 0], [], []>} : vector<16x32xbf16>, vector<48x32xbf16>, vector<16x48xf32> -> vector<16x48xf32>
    %cst_31 = arith.constant dense<0xFF800000> : vector<16xf32>
    %58 = vector.multi_reduction <maximumf>, %57, %cst_31 [1] : vector<16x48xf32> to vector<16xf32>
    %59 = vector.shape_cast %58 : vector<16xf32> to vector<16x1xf32>
    %60 = vector.broadcast %59 : vector<16x1xf32> to vector<16x48xf32>
    %61 = arith.subf %57, %60 : vector<16x48xf32>
    %62 = math.exp %61 : vector<16x48xf32>
    %cst_32 = arith.constant dense<0.000000e+00> : vector<16xf32>
    %63 = vector.multi_reduction <add>, %62, %cst_32 [1] : vector<16x48xf32> to vector<16xf32>
    %64 = vector.shape_cast %63 : vector<16xf32> to vector<16x1xf32>
    %65 = tpu.reciprocal %64 {approx = true} : vector<16x1xf32> -> vector<16x1xf32>
    %66 = vector.broadcast %65 : vector<16x1xf32> to vector<16x48xf32>
    %67 = arith.mulf %62, %66 : vector<16x48xf32>
    %68 = arith.truncf %67 : vector<16x48xf32> to vector<16x48xbf16>
    %c0_33 = arith.constant 0 : index
    %c32_34 = arith.constant 32 : index
    %69 = vector.load %arg22[%c0_33, %c32_34] : memref<48x128xbf16, #tpu.memory_space<vmem>>, vector<48x32xbf16>
    %cst_35 = arith.constant dense<0.000000e+00> : vector<16x32xf32>
    %70 = tpu.matmul %68, %69, %cst_35 {dimension_numbers = #tpu.dot_dimension_numbers<[1], [0], [0], [1], [0, 0, 1, 1], [], []>} : vector<16x48xbf16>, vector<48x32xbf16>, vector<16x32xf32> -> vector<16x32xf32>
    %71 = arith.truncf %70 : vector<16x32xf32> to vector<16x32xbf16>
    %c32_36 = arith.constant 32 : index
    %c0_37 = arith.constant 0 : index
    %72 = vector.load %arg13[%c32_36, %c0_37] : memref<128x128xbf16, #tpu.memory_space<vmem>>, vector<32x128xbf16>
    %cst_38 = arith.constant dense<0.000000e+00> : vector<16x128xf32>
    %73 = tpu.matmul %71, %72, %cst_38 {dimension_numbers = #tpu.dot_dimension_numbers<[1], [0], [0], [1], [0, 0, 1, 1], [], []>} : vector<16x32xbf16>, vector<32x128xbf16>, vector<16x128xf32> -> vector<16x128xf32>
    %74 = arith.addf %54, %73 : vector<16x128xf32>
    %75 = vector.extract_strided_slice %33 {offsets = [0, 64], sizes = [16, 32], strides = [1, 1]} : vector<16x128xbf16> to vector<16x32xbf16>
    %c0_39 = arith.constant 0 : index
    %c64 = arith.constant 64 : index
    %76 = vector.load %arg21[%c0_39, %c64] : memref<48x128xbf16, #tpu.memory_space<vmem>>, vector<48x32xbf16>
    %cst_40 = arith.constant dense<0.000000e+00> : vector<16x48xf32>
    %77 = tpu.matmul %75, %76, %cst_40 {dimension_numbers = #tpu.dot_dimension_numbers<[1], [1], [0], [0], [0, 0, 1, 0], [], []>} : vector<16x32xbf16>, vector<48x32xbf16>, vector<16x48xf32> -> vector<16x48xf32>
    %cst_41 = arith.constant dense<0xFF800000> : vector<16xf32>
    %78 = vector.multi_reduction <maximumf>, %77, %cst_41 [1] : vector<16x48xf32> to vector<16xf32>
    %79 = vector.shape_cast %78 : vector<16xf32> to vector<16x1xf32>
    %80 = vector.broadcast %79 : vector<16x1xf32> to vector<16x48xf32>
    %81 = arith.subf %77, %80 : vector<16x48xf32>
    %82 = math.exp %81 : vector<16x48xf32>
    %cst_42 = arith.constant dense<0.000000e+00> : vector<16xf32>
    %83 = vector.multi_reduction <add>, %82, %cst_42 [1] : vector<16x48xf32> to vector<16xf32>
    %84 = vector.shape_cast %83 : vector<16xf32> to vector<16x1xf32>
    %85 = tpu.reciprocal %84 {approx = true} : vector<16x1xf32> -> vector<16x1xf32>
    %86 = vector.broadcast %85 : vector<16x1xf32> to vector<16x48xf32>
    %87 = arith.mulf %82, %86 : vector<16x48xf32>
    %88 = arith.truncf %87 : vector<16x48xf32> to vector<16x48xbf16>
    %c0_43 = arith.constant 0 : index
    %c64_44 = arith.constant 64 : index
    %89 = vector.load %arg22[%c0_43, %c64_44] : memref<48x128xbf16, #tpu.memory_space<vmem>>, vector<48x32xbf16>
    %cst_45 = arith.constant dense<0.000000e+00> : vector<16x32xf32>
    %90 = tpu.matmul %88, %89, %cst_45 {dimension_numbers = #tpu.dot_dimension_numbers<[1], [0], [0], [1], [0, 0, 1, 1], [], []>} : vector<16x48xbf16>, vector<48x32xbf16>, vector<16x32xf32> -> vector<16x32xf32>
    %91 = arith.truncf %90 : vector<16x32xf32> to vector<16x32xbf16>
    %c64_46 = arith.constant 64 : index
    %c0_47 = arith.constant 0 : index
    %92 = vector.load %arg13[%c64_46, %c0_47] : memref<128x128xbf16, #tpu.memory_space<vmem>>, vector<32x128xbf16>
    %cst_48 = arith.constant dense<0.000000e+00> : vector<16x128xf32>
    %93 = tpu.matmul %91, %92, %cst_48 {dimension_numbers = #tpu.dot_dimension_numbers<[1], [0], [0], [1], [0, 0, 1, 1], [], []>} : vector<16x32xbf16>, vector<32x128xbf16>, vector<16x128xf32> -> vector<16x128xf32>
    %94 = arith.addf %74, %93 : vector<16x128xf32>
    %95 = vector.extract_strided_slice %33 {offsets = [0, 96], sizes = [16, 32], strides = [1, 1]} : vector<16x128xbf16> to vector<16x32xbf16>
    %c0_49 = arith.constant 0 : index
    %c96 = arith.constant 96 : index
    %96 = vector.load %arg21[%c0_49, %c96] : memref<48x128xbf16, #tpu.memory_space<vmem>>, vector<48x32xbf16>
    %cst_50 = arith.constant dense<0.000000e+00> : vector<16x48xf32>
    %97 = tpu.matmul %95, %96, %cst_50 {dimension_numbers = #tpu.dot_dimension_numbers<[1], [1], [0], [0], [0, 0, 1, 0], [], []>} : vector<16x32xbf16>, vector<48x32xbf16>, vector<16x48xf32> -> vector<16x48xf32>
    %cst_51 = arith.constant dense<0xFF800000> : vector<16xf32>
    %98 = vector.multi_reduction <maximumf>, %97, %cst_51 [1] : vector<16x48xf32> to vector<16xf32>
    %99 = vector.shape_cast %98 : vector<16xf32> to vector<16x1xf32>
    %100 = vector.broadcast %99 : vector<16x1xf32> to vector<16x48xf32>
    %101 = arith.subf %97, %100 : vector<16x48xf32>
    %102 = math.exp %101 : vector<16x48xf32>
    %cst_52 = arith.constant dense<0.000000e+00> : vector<16xf32>
    %103 = vector.multi_reduction <add>, %102, %cst_52 [1] : vector<16x48xf32> to vector<16xf32>
    %104 = vector.shape_cast %103 : vector<16xf32> to vector<16x1xf32>
    %105 = tpu.reciprocal %104 {approx = true} : vector<16x1xf32> -> vector<16x1xf32>
    %106 = vector.broadcast %105 : vector<16x1xf32> to vector<16x48xf32>
    %107 = arith.mulf %102, %106 : vector<16x48xf32>
    %108 = arith.truncf %107 : vector<16x48xf32> to vector<16x48xbf16>
    %c0_53 = arith.constant 0 : index
    %c96_54 = arith.constant 96 : index
    %109 = vector.load %arg22[%c0_53, %c96_54] : memref<48x128xbf16, #tpu.memory_space<vmem>>, vector<48x32xbf16>
    %cst_55 = arith.constant dense<0.000000e+00> : vector<16x32xf32>
    %110 = tpu.matmul %108, %109, %cst_55 {dimension_numbers = #tpu.dot_dimension_numbers<[1], [0], [0], [1], [0, 0, 1, 1], [], []>} : vector<16x48xbf16>, vector<48x32xbf16>, vector<16x32xf32> -> vector<16x32xf32>
    %111 = arith.truncf %110 : vector<16x32xf32> to vector<16x32xbf16>
    %c96_56 = arith.constant 96 : index
    %c0_57 = arith.constant 0 : index
    %112 = vector.load %arg13[%c96_56, %c0_57] : memref<128x128xbf16, #tpu.memory_space<vmem>>, vector<32x128xbf16>
    %cst_58 = arith.constant dense<0.000000e+00> : vector<16x128xf32>
    %113 = tpu.matmul %111, %112, %cst_58 {dimension_numbers = #tpu.dot_dimension_numbers<[1], [0], [0], [1], [0, 0, 1, 1], [], []>} : vector<16x32xbf16>, vector<32x128xbf16>, vector<16x128xf32> -> vector<16x128xf32>
    %114 = arith.addf %94, %113 : vector<16x128xf32>
    %c0_59 = arith.constant 0 : index
    %c0_60 = arith.constant 0 : index
    %115 = vector.load %arg14[%c0_59, %c0_60] : memref<1x128xf32, #tpu.memory_space<vmem>>, vector<1x128xf32>
    %116 = vector.broadcast %115 : vector<1x128xf32> to vector<16x128xf32>
    %117 = arith.addf %114, %116 : vector<16x128xf32>
    %118 = vector.broadcast %2 : vector<1x128xf32> to vector<16x128xf32>
    %119 = arith.mulf %117, %118 : vector<16x128xf32>
    %120 = arith.addf %15, %119 : vector<16x128xf32>
    %cst_61 = arith.constant dense<0.000000e+00> : vector<16xf32>
    %121 = vector.multi_reduction <add>, %120, %cst_61 [1] : vector<16x128xf32> to vector<16xf32>
    %122 = vector.shape_cast %121 : vector<16xf32> to vector<16x1xf32>
    %cst_62 = arith.constant 1.280000e+02 : f32
    %123 = vector.broadcast %cst_62 : f32 to vector<16x1xf32>
    %124 = arith.divf %122, %123 : vector<16x1xf32>
    %125 = vector.broadcast %124 : vector<16x1xf32> to vector<16x128xf32>
    %126 = arith.subf %120, %125 : vector<16x128xf32>
    %127 = arith.mulf %126, %126 : vector<16x128xf32>
    %cst_63 = arith.constant dense<0.000000e+00> : vector<16xf32>
    %128 = vector.multi_reduction <add>, %127, %cst_63 [1] : vector<16x128xf32> to vector<16xf32>
    %129 = vector.shape_cast %128 : vector<16xf32> to vector<16x1xf32>
    %cst_64 = arith.constant 1.280000e+02 : f32
    %130 = vector.broadcast %cst_64 : f32 to vector<16x1xf32>
    %131 = arith.divf %129, %130 : vector<16x1xf32>
    %cst_65 = arith.constant 9.99999997E-7 : f32
    %132 = vector.broadcast %cst_65 : f32 to vector<16x1xf32>
    %133 = arith.addf %131, %132 : vector<16x1xf32>
    %134 = math.rsqrt %133 : vector<16x1xf32>
    %135 = vector.broadcast %134 : vector<16x1xf32> to vector<16x128xf32>
    %136 = arith.mulf %126, %135 : vector<16x128xf32>
    %cst_66 = arith.constant 1.000000e+00 : f32
    %137 = vector.broadcast %cst_66 : f32 to vector<1x128xf32>
    %138 = arith.addf %5, %137 : vector<1x128xf32>
    %139 = vector.broadcast %138 : vector<1x128xf32> to vector<16x128xf32>
    %140 = arith.mulf %136, %139 : vector<16x128xf32>
    %141 = vector.broadcast %7 : vector<1x128xf32> to vector<16x128xf32>
    %142 = arith.addf %140, %141 : vector<16x128xf32>
    %143 = arith.truncf %142 : vector<16x128xf32> to vector<16x128xbf16>
    %c0_67 = arith.constant 0 : index
    %c0_68 = arith.constant 0 : index
    %144 = vector.load %arg15[%c0_67, %c0_68] : memref<128x512xbf16, #tpu.memory_space<vmem>>, vector<128x512xbf16>
    %cst_69 = arith.constant dense<0.000000e+00> : vector<16x512xf32>
    %145 = tpu.matmul %143, %144, %cst_69 {dimension_numbers = #tpu.dot_dimension_numbers<[1], [0], [0], [1], [0, 0, 1, 1], [], []>} : vector<16x128xbf16>, vector<128x512xbf16>, vector<16x512xf32> -> vector<16x512xf32>
    %c0_70 = arith.constant 0 : index
    %c0_71 = arith.constant 0 : index
    %146 = vector.load %arg16[%c0_70, %c0_71] : memref<1x512xf32, #tpu.memory_space<vmem>>, vector<1x512xf32>
    %147 = vector.broadcast %146 : vector<1x512xf32> to vector<16x512xf32>
    %148 = arith.addf %145, %147 : vector<16x512xf32>
    %cst_72 = arith.constant 5.000000e-01 : f32
    %149 = vector.broadcast %cst_72 : f32 to vector<16x512xf32>
    %150 = arith.mulf %149, %148 : vector<16x512xf32>
    %cst_73 = arith.constant 4.471500e-02 : f32
    %151 = vector.broadcast %cst_73 : f32 to vector<16x512xf32>
    %152 = arith.mulf %151, %148 : vector<16x512xf32>
    %153 = arith.mulf %152, %148 : vector<16x512xf32>
    %154 = arith.mulf %153, %148 : vector<16x512xf32>
    %155 = arith.addf %148, %154 : vector<16x512xf32>
    %cst_74 = arith.constant 0.797884583 : f32
    %156 = vector.broadcast %cst_74 : f32 to vector<16x512xf32>
    %157 = arith.mulf %156, %155 : vector<16x512xf32>
    %158 = math.tanh %157 : vector<16x512xf32>
    %cst_75 = arith.constant 1.000000e+00 : f32
    %159 = vector.broadcast %cst_75 : f32 to vector<16x512xf32>
    %160 = arith.addf %159, %158 : vector<16x512xf32>
    %161 = arith.mulf %150, %160 : vector<16x512xf32>
    %162 = arith.truncf %161 : vector<16x512xf32> to vector<16x512xbf16>
    %c0_76 = arith.constant 0 : index
    %c0_77 = arith.constant 0 : index
    %163 = vector.load %arg17[%c0_76, %c0_77] : memref<512x128xbf16, #tpu.memory_space<vmem>>, vector<512x128xbf16>
    %cst_78 = arith.constant dense<0.000000e+00> : vector<16x128xf32>
    %164 = tpu.matmul %162, %163, %cst_78 {dimension_numbers = #tpu.dot_dimension_numbers<[1], [0], [0], [1], [0, 0, 1, 1], [], []>} : vector<16x512xbf16>, vector<512x128xbf16>, vector<16x128xf32> -> vector<16x128xf32>
    %c0_79 = arith.constant 0 : index
    %c0_80 = arith.constant 0 : index
    %165 = vector.load %arg18[%c0_79, %c0_80] : memref<1x128xf32, #tpu.memory_space<vmem>>, vector<1x128xf32>
    %166 = vector.broadcast %165 : vector<1x128xf32> to vector<16x128xf32>
    %167 = arith.addf %164, %166 : vector<16x128xf32>
    %168 = vector.broadcast %3 : vector<1x128xf32> to vector<16x128xf32>
    %169 = arith.mulf %167, %168 : vector<16x128xf32>
    %170 = arith.addf %120, %169 : vector<16x128xf32>
    %c0_81 = arith.constant 0 : index
    %c0_82 = arith.constant 0 : index
    %c0_83 = arith.constant 0 : index
    %171 = vector.load %arg19[%c0_81, %c0_82, %c0_83] : memref<1x16x128xf32, #tpu.memory_space<vmem>>, vector<1x16x128xf32>
    %172 = vector.shape_cast %171 : vector<1x16x128xf32> to vector<16x128xf32>
    %173 = vector.shape_cast %170 : vector<16x128xf32> to vector<1x16x128xf32>
    tpu.vector_store %arg19[%c0_81, %c0_82, %c0_83], %173 {strides = array<i32>} : memref<1x16x128xf32, #tpu.memory_space<vmem>>, vector<1x16x128xf32>,
    return
  }
  func.func @transform_0(%arg0: i32, %arg1: i32) -> (i32, i32, i32) {
    %c0_i32 = arith.constant 0 : i32
    %c0_i32_0 = arith.constant 0 : i32
    %c0_i32_1 = arith.constant 0 : i32
    return %arg0, %c0_i32, %c0_i32_0 : i32, i32, i32
  }
  func.func @transform_1(%arg0: i32, %arg1: i32) -> (i32, i32, i32) {
    %c0_i32 = arith.constant 0 : i32
    %c0_i32_0 = arith.constant 0 : i32
    return %arg0, %arg1, %c0_i32 : i32, i32, i32
  }
  func.func @transform_2(%arg0: i32, %arg1: i32) -> (i32, i32, i32) {
    %c0_i32 = arith.constant 0 : i32
    %c0_i32_0 = arith.constant 0 : i32
    %c0_i32_1 = arith.constant 0 : i32
    return %arg0, %c0_i32, %c0_i32_0 : i32, i32, i32
  }
  func.func @transform_3(%arg0: i32, %arg1: i32) -> (i32, i32, i32) {
    %c0_i32 = arith.constant 0 : i32
    %c0_i32_0 = arith.constant 0 : i32
    %c0_i32_1 = arith.constant 0 : i32
    return %arg0, %c0_i32, %c0_i32_0 : i32, i32, i32
  }
  func.func @transform_4(%arg0: i32, %arg1: i32) -> (i32, i32) {
    %c0_i32 = arith.constant 0 : i32
    %c0_i32_0 = arith.constant 0 : i32
    %c0_i32_1 = arith.constant 0 : i32
    return %c0_i32, %c0_i32_0 : i32, i32
  }
  func.func @transform_5(%arg0: i32, %arg1: i32) -> (i32, i32) {
    %c0_i32 = arith.constant 0 : i32
    %c0_i32_0 = arith.constant 0 : i32
    %c0_i32_1 = arith.constant 0 : i32
    return %c0_i32, %c0_i32_0 : i32, i32
  }
  func.func @transform_6(%arg0: i32, %arg1: i32) -> (i32, i32) {
    %c0_i32 = arith.constant 0 : i32
    %c0_i32_0 = arith.constant 0 : i32
    %c0_i32_1 = arith.constant 0 : i32
    return %c0_i32, %c0_i32_0 : i32, i32
  }
  func.func @transform_7(%arg0: i32, %arg1: i32) -> (i32, i32) {
    %c0_i32 = arith.constant 0 : i32
    %c0_i32_0 = arith.constant 0 : i32
    %c0_i32_1 = arith.constant 0 : i32
    return %c0_i32, %c0_i32_0 : i32, i32
  }
  func.func @transform_8(%arg0: i32, %arg1: i32) -> (i32, i32) {
    %c0_i32 = arith.constant 0 : i32
    %c0_i32_0 = arith.constant 0 : i32
    %c0_i32_1 = arith.constant 0 : i32
    return %c0_i32, %c0_i32_0 : i32, i32
  }
  func.func @transform_9(%arg0: i32, %arg1: i32) -> (i32, i32) {
    %c0_i32 = arith.constant 0 : i32
    %c0_i32_0 = arith.constant 0 : i32
    %c0_i32_1 = arith.constant 0 : i32
    return %c0_i32, %c0_i32_0 : i32, i32
  }
  func.func @transform_10(%arg0: i32, %arg1: i32) -> (i32, i32) {
    %c0_i32 = arith.constant 0 : i32
    %c0_i32_0 = arith.constant 0 : i32
    %c0_i32_1 = arith.constant 0 : i32
    return %c0_i32, %c0_i32_0 : i32, i32
  }
  func.func @transform_11(%arg0: i32, %arg1: i32) -> (i32, i32) {
    %c0_i32 = arith.constant 0 : i32
    %c0_i32_0 = arith.constant 0 : i32
    %c0_i32_1 = arith.constant 0 : i32
    return %c0_i32, %c0_i32_0 : i32, i32
  }
  func.func @transform_12(%arg0: i32, %arg1: i32) -> (i32, i32) {
    %c0_i32 = arith.constant 0 : i32
    %c0_i32_0 = arith.constant 0 : i32
    %c0_i32_1 = arith.constant 0 : i32
    return %c0_i32, %c0_i32_0 : i32, i32
  }
  func.func @transform_13(%arg0: i32, %arg1: i32) -> (i32, i32) {
    %c0_i32 = arith.constant 0 : i32
    %c0_i32_0 = arith.constant 0 : i32
    %c0_i32_1 = arith.constant 0 : i32
    return %c0_i32, %c0_i32_0 : i32, i32
  }
  func.func @transform_14(%arg0: i32, %arg1: i32) -> (i32, i32) {
    %c0_i32 = arith.constant 0 : i32
    %c0_i32_0 = arith.constant 0 : i32
    %c0_i32_1 = arith.constant 0 : i32
    return %c0_i32, %c0_i32_0 : i32, i32
  }
  func.func @transform_15(%arg0: i32, %arg1: i32) -> (i32, i32) {
    %c0_i32 = arith.constant 0 : i32
    %c0_i32_0 = arith.constant 0 : i32
    %c0_i32_1 = arith.constant 0 : i32
    return %c0_i32, %c0_i32_0 : i32, i32
  }
  func.func @transform_16(%arg0: i32, %arg1: i32) -> (i32, i32) {
    %c0_i32 = arith.constant 0 : i32
    %c0_i32_0 = arith.constant 0 : i32
    %c0_i32_1 = arith.constant 0 : i32
    return %c0_i32, %c0_i32_0 : i32, i32
  }
  func.func @transform_17(%arg0: i32, %arg1: i32) -> (i32, i32, i32) {
    %c0_i32 = arith.constant 0 : i32
    %c0_i32_0 = arith.constant 0 : i32
    return %arg0, %arg1, %c0_i32 : i32, i32, i32
  }
}

</mosaic_0001>

<bundles_post_ra>
// kernel: tpu_custom_call.1
= control target key start
LH: loop header
LB: loop body
LE: loop exit
PB: predicated region body
PF: predicated region fallthrough
CT: control target
= control target key end

     0   :  { %s5943_s0 = inlined_call_operand.hbm [shape: bf16[2,32,128], index: 0, kind: input, shape index: {}]   ;;  %s5944_s1 = inlined_call_operand.hbm [shape: f32[2,32,128], index: 1, kind: input, shape index: {}]   ;;  %s5945_s2 = inlined_call_operand.vmem [shape: bf16[2,16,128], index: 2, kind: input, shape index: {}]   ;;  %s5946_s3 = inlined_call_operand.vmem [shape: f32[2,6,128], index: 3, kind: input, shape index: {}]   ;;  %s5947_s4 = inlined_call_operand.vmem [shape: f32[1,128], index: 4, kind: input, shape index: {}]   ;;  %s5948_s5 = inlined_call_operand.hbm [shape: bf16[128,128], index: 5, kind: input, shape index: {}]   ;;  %s5949_s6 = inlined_call_operand.hbm [shape: bf16[128,128], index: 6, kind: input, shape index: {}]   ;;  %s5950_s7 = inlined_call_operand.vmem [shape: f32[1,128], index: 7, kind: input, shape index: {}]   ;;  %s5951_s8 = inlined_call_operand.hbm [shape: bf16[128,128], index: 8, kind: input, shape index: {}]   ;;  %s5952_s9 = inlined_call_operand.hbm [shape: bf16[128,128], index: 9, kind: input, shape index: {}]   ;;  %s5953_s10 = inlined_call_operand.vmem [shape: f32[1,128], index: 10, kind: input, shape index: {}]   ;;  %s5954_s11 = inlined_call_operand.hbm [shape: bf16[128,128], index: 11, kind: input, shape index: {}]   ;;  %s5955_s12 = inlined_call_operand.vmem [shape: f32[1,128], index: 12, kind: input, shape index: {}]   ;;  %s5956_s13 = inlined_call_operand.hbm [shape: bf16[128,512], index: 13, kind: input, shape index: {}]   ;;  %s5957_s14 = inlined_call_operand.vmem [shape: f32[1,512], index: 14, kind: input, shape index: {}]   ;;  %s5958_s15 = inlined_call_operand.hbm [shape: bf16[512,128], index: 15, kind: input, shape index: {}]   ;;  %s5959_s16 = inlined_call_operand.vmem [shape: f32[1,128], index: 16, kind: input, shape index: {}]   ;;  %s5960_s17 = inlined_call_operand.hbm [shape: f32[2,32,128], index: 17, kind: output, shape index: {}]  }
   0x1   :  { %5978 = sst [smem:[#allocation36_spill]] %s5943_s0 }
   0x2   :  { %5979 = sst [smem:[#allocation37_spill]] %s5944_s1 }
   0x3   :  { %5980 = sst [smem:[#allocation38_spill]] %s5945_s2 }
   0x4   :  { %5981 = sst [smem:[#allocation39_spill]] %s5946_s3 }
   0x5   :  { %5982 = sst [smem:[#allocation40_spill]] %s5947_s4 }
   0x6   :  { %5983 = sst [smem:[#allocation41_spill]] %s5948_s5 }
   0x7   :  { %5984 = sst [smem:[#allocation42_spill]] %s5949_s6 }
   0x8   :  { %5985 = sst [smem:[#allocation43_spill]] %s5950_s7 }
   0x9   :  { %5986 = sst [smem:[#allocation44_spill]] %s5951_s8 }
   0xa   :  { %5987 = sst [smem:[#allocation45_spill]] %s5952_s9 }
   0xb   :  { %5988 = sst [smem:[#allocation46_spill]] %s5953_s10 }
   0xc   :  { %5989 = sst [smem:[#allocation47_spill]] %s5954_s11 }
   0xd   :  { %5990 = sst [smem:[#allocation48_spill]] %s5955_s12 }
   0xe   :  { %5991 = sst [smem:[#allocation49_spill]] %s5956_s13 }
   0xf   :  { %5992 = sst [smem:[#allocation50_spill]] %s5957_s14 }
  0x10   :  { %5993 = sst [smem:[#allocation51_spill]] %s5958_s15 }
  0x11   :  { %5994 = sst [smem:[#allocation52_spill]] %s5959_s16 }
  0x12   :  { %5995 = sst [smem:[#allocation53_spill]] %s5960_s17 }
  0x13   :  { %22 = vsyncpa [#allocation6], 0 }
  0x14   :  { %24 = vsyncpa [#allocation6 + $0x1], 0 }
  0x15   :  { %25 = vsyncpa [#allocation9], 0 }
  0x16   :  { %27 = vsyncpa [#allocation9 + $0x1], 0 }
  0x17   :  { %28 = vsyncpa [#allocation12], 0 }
  0x18   :  { %29 = vsyncpa [#allocation15], 0 }
  0x19   :  { %30 = vsyncpa [#allocation18], 0 }
  0x1a   :  { %31 = vsyncpa [#allocation7], 0 }
  0x1b   :  { %33 = vsyncpa [#allocation7 + $0x1], 0  ;;  %s5080_s24 = smov 0   ;;  %s5082_s25 = smov 0  }
  0x1c   :  { %s5084_s26 = smov 0   ;;  %s5086_s27 = smov 0  }
  0x1d   :  { %s5088_s28 = smov 0   ;;  %s5090_s29 = smov 0  }
  0x1e   :  { %s5092_s0 = smov 0   ;;  %s5094_s30 = smov 0  }
  0x1f   :  { %s5096_s18 = smov 0   ;;  %s5098_s19 = smov 0  }
  0x20   :  { %s5100_s1 = smov 0  }
  0x21 LB: > { %5996 = sst [smem:[#allocation28_spill]] %s4922_s24  ;;  %s5136_s20 = sadd.s32 4294967295, %s4962_s1   ;;  %s4962_s1 = sphi %s5100_s1, %s39_s1   ;;  %s4958_s19 = sphi %s5098_s19, %s6067_s19   ;;  %s4954_s18 = sphi %s5096_s18, %s6066_s18   ;;  %s4950_s30 = sphi %s5094_s30, %s6065_s30   ;;  %s4946_s0 = sphi %s5092_s0, %s6064_s0   ;;  %s4942_s29 = sphi %s5090_s29, %s6063_s29   ;;  %s4938_s28 = sphi %s5088_s28, %s6062_s28   ;;  %s4934_s27 = sphi %s5086_s27, %s6061_s27   ;;  %s4930_s26 = sphi %s5084_s26, %s6060_s26   ;;  %s4926_s25 = sphi %s5082_s25, %s6059_s25   ;;  %s4922_s24 = sphi %s5080_s24, %s6058_s24  }
  0x22   : > { %5997 = sst [smem:[#allocation29_spill]] %s4946_s0  ;;  %p3495_p0 = scmp.ge.s32.totalorder %s4962_s1, 1 }
  0x23   : > { %5998 = sst [smem:[#allocation30_spill]] %s4950_s30  ;;  %p5967_p1 = scmp.eq.s32.totalorder %s5136_s20, 0 }
  0x24   : > { %p463_p2 = scmp.lt.s32.totalorder %s4962_s1, 5  ;;  %s4964_s22 = smov [#allocation10]  }
  0x25   : > { %s478_s23 = sshll.u32 %s4964_s22, 4  ;;  %s4965_s16 = smov [#allocation11]   ;;  %s479_s23 = int_to_ptr.vmem [resolvable:$true] %s478_s23 }
  0x26   : > { %p5141_p3 = pnand %p3495_p0, %p463_p2  ;;  %s491_s14 = sshll.u32 %s4965_s16, 4  ;;  %s492_s14 = int_to_ptr.vmem [resolvable:$true] %s491_s14 }
  0x27   : > { %s4966_s12 = smov [#allocation14]   ;;  %s4595_s22 = scalar_lea.vmem %s479_s23, 1024 }
  0x28   : > { %p4228_p4 = pneg %p5141_p3  ;;  %s520_s4 = sshll.u32 %s4966_s12, 4  ;;  %s521_s4 = int_to_ptr.vmem [resolvable:$true] %s520_s4 }
  0x29   : > { %p4596_p7 = scmp.ne.s32.totalorder %s479_s23, %s4595_s22  ;;  %p4603_p10 = scmp.lt.s32.totalorder %s479_s23, %s479_s23 }
  0x2a   : > { %p5149_p5 = pnand %p4228_p4, %p5967_p1  ;;  %p4604_p11 = scmp.lt.s32.totalorder %s4595_s22, %s4595_s22 }
  0x2c   : > { %p5155_p6 = pneg %p5149_p5  ;;  %p4605_p12 = por %p4604_p11, %p4603_p10 }
  0x2e   : > { %p4598_p8 = pnand %p4596_p7, %p5155_p6 }
  0x30   : > { %p4599_p9 = pneg %p4598_p8 }
  0x32   : > { %p4606_p13 = pnand %p4605_p12, %p4599_p9 }
  0x34   : > { %4609 = shalt.err (!%p4606_p13)
}
  0x35   : > { %s5963_s16 = smov 64   ;;  %s5965_s12 = smov 4  }
  0x36   : > { %s6002_s5 = sld [smem:[#allocation41_spill]]  ;;  %s4621_s3 = scalar_lea.vmem %s492_s14, 1024 }
  0x37   : > { %p4622_p0 = scmp.ne.s32.totalorder %s492_s14, %s4621_s3  ;;  %p4629_p7 = scmp.lt.s32.totalorder %s492_s14, %s492_s14 }
  0x38   : > { %p4630_p8 = scmp.lt.s32.totalorder %s4621_s3, %s4621_s3 }
  0x39   : > { %p4624_p2 = pnand %p4622_p0, %p5155_p6 }
  0x3a   : > { %p4631_p9 = por %p4630_p8, %p4629_p7 }
  0x3b   : > { %p4625_p4 = pneg %p4624_p2 }
  0x3c   : > { %4231 = dma.hbm_to_vmem [thread:$0]  (!%p5149_p5), %s6002_s5, 1024, %s479_s23, [#allocation9], %s5963_s16, %s5963_s16, %s5965_s12  }
  0x3d   : > { %p4632_p10 = pnand %p4631_p9, %p4625_p4 }
  0x3f   : > { %4635 = shalt.err (!%p4632_p10)
}
  0x40   : > { %s6003_s6 = sld [smem:[#allocation42_spill]]  ;;  %s4647_s10 = scalar_lea.vmem %s521_s4, 1024 }
  0x41   : > { %p4648_p11 = scmp.ne.s32.totalorder %s521_s4, %s4647_s10  ;;  %p4655_p0 = scmp.lt.s32.totalorder %s521_s4, %s521_s4 }
  0x42   : > { %p4656_p2 = scmp.lt.s32.totalorder %s4647_s10, %s4647_s10 }
  0x43   : > { %p4650_p12 = pnand %p4648_p11, %p5155_p6 }
  0x44   : > { %p4657_p4 = por %p4656_p2, %p4655_p0 }
  0x45   : > { %p4651_p13 = pneg %p4650_p12 }
  0x46   : > { %4234 = dma.hbm_to_vmem [thread:$0]  (!%p5149_p5), %s6003_s6, 1024, %s492_s14, [#allocation12], %s5963_s16, %s5963_s16, %s5965_s12  }
  0x47   : > { %p4658_p7 = pnand %p4657_p4, %p4651_p13 }
  0x49   : > { %4661 = shalt.err (!%p4658_p7)
}
  0x4a   : > { %s6004_s9 = sld [smem:[#allocation45_spill]]  ;;  %s4969_s14 = smov [#allocation17]  }
  0x4b   : > { %s552_s0 = sshll.u32 %s4969_s14, 4  ;;  %s553_s0 = int_to_ptr.vmem [resolvable:$true] %s552_s0 }
  0x4c   : > { %s4673_s23 = scalar_lea.vmem %s553_s0, 4096  ;;  %p4681_p11 = scmp.lt.s32.totalorder %s553_s0, %s553_s0 }
  0x4d   : > { %p4674_p8 = scmp.ne.s32.totalorder %s553_s0, %s4673_s23  ;;  %p4682_p12 = scmp.lt.s32.totalorder %s4673_s23, %s4673_s23 }
  0x4f   : > { %p4676_p9 = pnand %p4674_p8, %p5155_p6  ;;  %p4683_p13 = por %p4682_p12, %p4681_p11 }
  0x50   : > { %4240 = dma.hbm_to_vmem [thread:$0]  (!%p5149_p5), %s6004_s9, 1024, %s521_s4, [#allocation15], %s5963_s16, %s5963_s16, %s5965_s12  }
  0x51   : > { %p4677_p10 = pneg %p4676_p9 }
  0x53   : > { %p4684_p0 = pnand %p4683_p13, %p4677_p10 }
  0x55   : > { %4687 = shalt.err (!%p4684_p0)
}
  0x56   : > { %s4970_s22 = smov 256   ;;  %s4971_s10 = smov 16  }
  0x57   : > { %s6005_s13 = sld [smem:[#allocation49_spill]]  ;;  %s4972_s2 = smov [#allocation13]  }
  0x58   : > { %s507_s14 = sshll.u32 %s4972_s2, 4  ;;  %s4973_s16 = smov [#allocation16]   ;;  %s508_s14 = int_to_ptr.vmem [resolvable:$true] %s507_s14 }
  0x59   : > { %s536_s12 = sshll.u32 %s4973_s16, 4  ;;  %s4699_s5 = scalar_lea.vmem %s508_s14, 1024  ;;  %s537_s12 = int_to_ptr.vmem [resolvable:$true] %s536_s12 }
  0x5a   : > { %p4700_p2 = scmp.ne.s32.totalorder %s508_s14, %s4699_s5  ;;  %p4707_p8 = scmp.lt.s32.totalorder %s508_s14, %s508_s14 }
  0x5b   : > { %p4708_p9 = scmp.lt.s32.totalorder %s4699_s5, %s4699_s5 }
  0x5c   : > { %p4702_p4 = pnand %p4700_p2, %p5155_p6 }
  0x5d   : > { %4246 = dma.hbm_to_vmem [thread:$0]  (!%p5149_p5), %s6005_s13, 4096, %s553_s0, [#allocation18], %s4970_s22, %s4970_s22, %s4971_s10  }
  0x5e   : > { %p4703_p7 = pneg %p4702_p4  ;;  %p4709_p10 = por %p4708_p9, %p4707_p8 }
  0x60   : > { %p4710_p11 = pnand %p4709_p10, %p4703_p7 }
  0x62   : > { %4713 = shalt.err (!%p4710_p11)
}
  0x63   : > { %s6006_s23 = smov 4   ;;  %s6007_s0 = smov 64  }
  0x64   : > { %s6008_s8 = sld [smem:[#allocation44_spill]]  ;;  %s4725_s16 = scalar_lea.vmem %s537_s12, 1024 }
  0x65   : > { %p4726_p12 = scmp.ne.s32.totalorder %s537_s12, %s4725_s16  ;;  %p4733_p2 = scmp.lt.s32.totalorder %s537_s12, %s537_s12 }
  0x66   : > { %p4734_p4 = scmp.lt.s32.totalorder %s4725_s16, %s4725_s16 }
  0x67   : > { %p4728_p13 = pnand %p4726_p12, %p5155_p6 }
  0x68   : > { %p4735_p8 = por %p4734_p4, %p4733_p2 }
  0x69   : > { %p4729_p0 = pneg %p4728_p13 }
  0x6a   : > { %4237 = dma.hbm_to_vmem [thread:$0]  (!%p5149_p5), %s6008_s8, 1024, %s508_s14, [#allocation12], %s6007_s0, %s6007_s0, %s6006_s23  }
  0x6b   : > { %p4736_p7 = pnand %p4735_p8, %p4729_p0 }
  0x6d   : > { %4739 = shalt.err (!%p4736_p7)
}
  0x6e   : > { %s6009_s11 = sld [smem:[#allocation47_spill]]  ;;  %s4974_s4 = smov [#allocation19]  }
  0x6f   : > { %s568_s2 = sshll.u32 %s4974_s4, 4  ;;  %s569_s2 = int_to_ptr.vmem [resolvable:$true] %s568_s2 }
  0x70   : > { %s4751_s14 = scalar_lea.vmem %s569_s2, 4096  ;;  %p4759_p12 = scmp.lt.s32.totalorder %s569_s2, %s569_s2 }
  0x71   : > { %p4752_p9 = scmp.ne.s32.totalorder %s569_s2, %s4751_s14  ;;  %p4760_p13 = scmp.lt.s32.totalorder %s4751_s14, %s4751_s14 }
  0x73   : > { %p4754_p10 = pnand %p4752_p9, %p5155_p6  ;;  %p4761_p0 = por %p4760_p13, %p4759_p12 }
  0x74   : > { %4243 = dma.hbm_to_vmem [thread:$0]  (!%p5149_p5), %s6009_s11, 1024, %s537_s12, [#allocation15], %s6007_s0, %s6007_s0, %s6006_s23  }
  0x75   : > { %p4755_p11 = pneg %p4754_p10 }
  0x77   : > { %p4762_p2 = pnand %p4761_p0, %p4755_p11 }
  0x79   : > { %4765 = shalt.err (!%p4762_p2)
}
  0x7a   : > { %s6010_s15 = sld [smem:[#allocation51_spill]]  ;;  %p65_p6 = scmp.ne.s32.totalorder %s4942_s29, %s4938_s28 }
  0x7b   : > { %p66_p4 = scmp.eq.s32.totalorder %s4962_s1, 0  ;;  %p71_p8 = scmp.ne.s32.totalorder %s4938_s28, %s4934_s27 }
  0x7c   : > { %p4268_p7 = scmp.lt.s32.totalorder %s4962_s1, 4  ;;  %s585_s10 = sand.u32 1, %s4942_s29  }
  0x7d   : > { %p67_p9 = por %p66_p4, %p65_p6  ;;  %p5239_p10 = por %p5967_p1, %p71_p8 }
  0x7e   : > { %s3504_s5 = sshll.u32 %s585_s10, 4  ;;  %s3687_s3 = sshll.u32 %s4958_s19, 8 }
  0x7f   : > { %s589_s12 = scalar_lea.vmem [#allocation5], %s3504_s5  ;;  %s586_s7 = scalar_lea.sflag [#allocation6], %s585_s10 }
  0x80   : > { %4249 = dma.hbm_to_vmem [thread:$0]  (!%p5149_p5), %s6010_s15, 4096, %s569_s2, [#allocation18], %s6007_s0, %s6007_s0, %s6006_s23  }
  0x81   : > { %s6012_s2 = sld [smem:[#allocation36_spill]]  ;;  %s596_s17 = sshll.u32 %s589_s12, 4  ;;  %s597_s17 = int_to_ptr.vmem [resolvable:$true] %s596_s17 }
  0x82   : > { %p5249_p5 = pnand %p4268_p7, %p67_p9  ;;  %s4779_s6 = scalar_lea.vmem %s597_s17, 256 }
  0x83   : > { %p4780_p12 = scmp.ne.s32.totalorder %s597_s17, %s4779_s6  ;;  %s4975_s8 = smov [#allocation5]  }
  0x84   : > { %p4768_p11 = pneg %p5249_p5  ;;  %s4784_s9 = sshll.u32 %s4975_s8, 4  ;;  %s4785_s9 = int_to_ptr.vmem [resolvable:$false] %s4784_s9 }
  0x85   : > { %p4787_p2 = scmp.lt.s32.totalorder %s597_s17, %s4785_s9 }
  0x86   : > { %p4782_p13 = pnand %p4780_p12, %p4768_p11 }
  0x87   : > { %s595_s22 = scalar_lea.hbm %s6012_s2, %s3687_s3  ;;  %s4786_s3 = scalar_lea.vmem %s4785_s9, 512 }
  0x88   : > { %p4783_p0 = pneg %p4782_p13  ;;  %p4788_p6 = scmp.lt.s32.totalorder %s4786_s3, %s4779_s6 }
  0x8a   : > { %p4789_p8 = por %p4788_p6, %p4787_p2 }
  0x8c   : > { %p4790_p1 = pnand %p4789_p8, %p4783_p0 }
  0x8e   : > { %4793 = shalt.err (!%p4790_p1)
}
  0x8f   : > { %4253 = dma.hbm_to_vmem [thread:$0]  (!%p5249_p5), %s595_s22, 256, %s597_s17, %s586_s7, %s6007_s0, %s6007_s0, %s6006_s23  }
  0x90   : > { %s3494_s6 = sadd.s32 4294967294, %s4962_s1   ;;  %s48_s8 = sadd.s32 1, %s4954_s18 }
  0x91   : > { %s86_s9 = sadd.s32 1, %s4930_s26  ;;  %p49_p1 = scmp.ge.s32.totalorder %s48_s8, 2 }
  0x92   : > { %p93_p9 = scmp.ne.s32.totalorder %s4930_s26, %s4926_s25  ;;  %p99_p11 = scmp.ne.s32.totalorder %s4926_s25, %s4922_s24 }
  0x93   : > { %p450_p12 = scmp.eq.s32.totalorder %s5136_s20, 3  ;;  %s6069_s8 = smov (%p49_p1, %s48_s8), 0 }
  0x94   : > { %6014 = sst [smem:[#allocation31_spill]] %s6069_s8  ;;  %s6015_s10 = sadd.s32 1, %s4958_s19 }
  0x95   : > { %s6071_s10 = smov (!%p49_p1, %s6015_s10), %s4958_s19  ;;  %s82_s5 = ssub.s32 %s4954_s18, %s6069_s8 }
  0x96   : > { %p5277_p5 = por %p93_p9, %p66_p4  ;;  %p53_p13 = scmp.ge.s32.totalorder %s6071_s10, 2 }
  0x97   : > { %p6017_p0 = scmp.eq.s32.totalorder %s5136_s20, 0  ;;  %p5287_p6 = por %p450_p12, %p93_p9 }
  0x98   : > { %p456_p8 = scmp.eq.s32.totalorder %s3494_s6, 3  ;;  %s6073_s10 = smov (%p53_p13, %s6071_s10), 0 }
  0x99   : > { %p5283_p2 = por %p99_p11, %p6017_p0  ;;  %6022 = sst [smem:[#allocation34_spill]] %s6073_s10 }
  0x9a   : > { %s6020_s7 = scalar_select %p5287_p6, 1, 0 }
  0x9b   : > { %s6018_s0 = scalar_select %p5283_p2, 1, 0 }
  0x9c   : > { %6021 = sst [smem:[#allocation33_spill]] %s6020_s7  ;;  %p5293_p4 = por %p456_p8, %p99_p11 }
  0x9d   : > { %6019 = sst [smem:[#allocation32_spill]] %s6018_s0  ;;  %s606_s4 = sand.u32 1, %s4962_s1  }
  0x9e   : > { %s6023_s17 = scalar_select %p5293_p4, 1, 0 }
  0x9f   : > { %s55_s14 = ssub.s32 %s4958_s19, %s6073_s10  ;;  %s608_s22 = sand.u32 1, %s4930_s26  }
  0xa0   : > { %6024 = sst [smem:[#allocation35_spill]] %s6023_s17  ;;  %p56_p1 = scmp.eq.s32.totalorder %s55_s14, 0 }
  0xa1   : > { %s83_s2 = sor.u32 %s82_s5, %s55_s14  ;;  %s6025_s12 = sadd.s32 1, %s4942_s29 }
  0xa2   : > { %p84_p0 = scmp.eq.s32.totalorder %s83_s2, 0  ;;  %s3507_s6 = sshll.u32 %s608_s22, 4 }
  0xa3   : > { %s5304_s27 = scalar_select %p56_p1, %s4942_s29, %s6025_s12  }
  0xa4   : > { %s5307_s3 = scalar_select %p84_p0, %s4930_s26, %s86_s9  }
  0xa5   : > { %s3508_s11 = sshll.u32 %s4954_s18, 1  ;;  %s3509_s13 = sshll.u32 %s4958_s19, 2 }
  0xa6   : > { %s616_s15 = sadd.s32 %s3509_s13, %s3508_s11  ;;  %s610_s8 = scalar_lea.vmem [#allocation8], %s3507_s6 }
  0xa7   : > { %s619_s24 = sshll.u32 %s610_s8, 4  ;;  %s3510_s17 = sshll.u32 %s616_s15, 7  ;;  %s620_s24 = int_to_ptr.vmem [resolvable:$true] %s619_s24 }
  0xa8   : > { %s6026_s30 = sld [smem:[#allocation37_spill]]  ;;  %p5318_p9 = pnand %p4268_p7, %p5277_p5 }
  0xa9   : > { %s607_s9 = scalar_lea.sflag [#allocation9], %s606_s4  ;;  %s4807_s14 = scalar_lea.vmem %s620_s24, 256 }
  0xaa   : > { %p4796_p11 = pneg %p5318_p9  ;;  %p4808_p12 = scmp.ne.s32.totalorder %s620_s24, %s4807_s14 }
  0xab   : > { %s4976_s11 = smov [#allocation8]  }
  0xac   : > { %p4810_p13 = pnand %p4808_p12, %p4796_p11  ;;  %s4812_s13 = sshll.u32 %s4976_s11, 4  ;;  %s4813_s13 = int_to_ptr.vmem [resolvable:$false] %s4812_s13 }
  0xad   : > { %s4814_s15 = scalar_lea.vmem %s4813_s13, 512  ;;  %p4815_p1 = scmp.lt.s32.totalorder %s620_s24, %s4813_s13 }
  0xae   : > { %s618_s0 = scalar_lea.hbm %s6026_s30, %s3510_s17  ;;  %p4811_p8 = pneg %p4810_p13 }
  0xaf   : > { %p4816_p0 = scmp.lt.s32.totalorder %s4814_s15, %s4807_s14 }
  0xb1   : > { %p4817_p4 = por %p4816_p0, %p4815_p1 }
  0xb3   : > { %p4818_p6 = pnand %p4817_p4, %p4811_p8 }
  0xb5   : > { %4821 = shalt.err (!%p4818_p6)
}
  0xb6   : > { %s4977_s30 = smov 128   ;;  %s4978_s8 = smov 8  }
  0xb7   : > { %4256 = dma.hbm_to_vmem [thread:$0]  (!%p5318_p9), %s618_s0, 256, %s620_s24, %s607_s9, %s4977_s30, %s4977_s30, %s4978_s8  }
  0xb8   : > { %646 = sbr.rel (%p5141_p3) target bundleno = 5121 (0x1401), region = 88  ;;  %s648_s10 = sand.u32 (!%p5141_p3), 1, %s4938_s28  }
  0xb9   : > { %s5329_s23 = sshll.u32 (!%p5141_p3), %s648_s10, 4  ;;  %s649_s7 = scalar_lea.sflag (!%p5141_p3), [#allocation6], %s648_s10 }
  0xba   : > { %s652_s17 = scalar_lea.vmem (!%p5141_p3), [#allocation5], %s5329_s23 }
  0xbd   : > { %4893 = dma.done.wait (%p5239_p10), %s649_s7, 256  }
  0xbe   : > { %4895 = vsyncadd (%p5239_p10), %s649_s7, 4294967040  ;;  %s657_s0 = sand.u32 1, %s5136_s20   ;;  %s659_s21 = sand.u32 1, %s4926_s25  }
  0xbf   : > { %s5340_s4 = sshll.u32 %s659_s21, 4  ;;  %s658_s2 = scalar_lea.sflag [#allocation9], %s657_s0 }
  0xc0   : > { %s661_s22 = scalar_lea.vmem [#allocation8], %s5340_s4 }
  0xc1   : > { %4897 = dma.done.wait (%p5283_p2), %s658_s2, 256  }
  0xc2   : > { %4899 = vsyncadd (%p5283_p2), %s658_s2, 4294967040  ;;  %p6029_p3 = scmp.eq.s32.totalorder %s5136_s20, 0 }
  0xc4   : > { %4901 = dma.done.wait (%p6029_p3), [#allocation9], 1024   ;;  %p6030_p7 = pmov %p6029_p3 }
  0xc5   : > { %p6031_p10 = pmov %p6029_p3 }
  0xc6   : > { %4903 = vsyncadd (%p6030_p7), [#allocation9], 4294966272 }
  0xc7   : > { %4905 = dma.done.wait (%p6031_p10), [#allocation12], 2048   ;;  %p6032_p5 = pmov %p6029_p3 }
  0xc8   : > { %p6033_p6 = pmov %p6029_p3 }
  0xc9   : > { %4907 = vsyncadd (%p6032_p5), [#allocation12], 4294965248 }
  0xca   : > { %4909 = dma.done.wait (%p6033_p6), [#allocation15], 2048   ;;  %p6034_p4 = pmov %p6029_p3 }
  0xcb   : > { %p6035_p2 = pmov %p6029_p3 }
  0xcc   : > { %4911 = vsyncadd (%p6034_p4), [#allocation15], 4294965248 }
  0xcd   : > { %4913 = dma.done.wait (%p6035_p2), [#allocation18], 8192   ;;  %p6036_p9 = pmov %p6035_p2 }
  0xce   : > { %s6037_s16 = sld [smem:[#allocation30_spill]]  ;;  %v5375_v1 = vld [vmem:[#allocation10] sm:$0xf]  ;;  %v5377_v2 = vld [vmem:[#allocation10 + $0x4] sm:$0xf]  ;;  %s5408_s20 = scalar_lea.vmem [#allocation20], %s5340_s4 }
  0xcf   : > { %4915 = vsyncadd (%p6036_p9), [#allocation18], 4294959104  ;;  %s6038_s9 = sld [smem:[#allocation38_spill]]  ;;  %v5379_v3 = vld [vmem:[#allocation10 + $0x8] sm:$0xf] }
  0xd0   : > { %s6039_s15 = sld [smem:[#allocation39_spill]]  ;;  %v5381_v4 = vld [vmem:[#allocation10 + $0xc] sm:$0xf]  ;;  %v5383_v5 = vld [vmem:[#allocation10 + $0x10] sm:$0xf] }
  0xd1   : > { %v5385_v6 = vld [vmem:[#allocation10 + $0x14] sm:$0xf]  ;;  %v5387_v7 = vld [vmem:[#allocation10 + $0x18] sm:$0xf]  ;;  %v5389_v8 = vld [vmem:[#allocation10 + $0x1c] sm:$0xf] }
  0xd2   : > { %v5391_v9 = vld [vmem:[#allocation10 + $0x20] sm:$0xf]  ;;  %v5393_v10 = vld [vmem:[#allocation10 + $0x24] sm:$0xf]  ;;  %v5395_v11 = vld [vmem:[#allocation10 + $0x28] sm:$0xf] }
  0xd3   : > { %v5397_v12 = vld [vmem:[#allocation10 + $0x2c] sm:$0xf]  ;;  %v5399_v13 = vld [vmem:[#allocation10 + $0x30] sm:$0xf]  ;;  %v5401_v14 = vld [vmem:[#allocation10 + $0x34] sm:$0xf] }
  0xd4   : > { %p755_p11 = scmp.lt.s32.totalorder %s6037_s16, 1  ;;  %v5403_v15 = vld [vmem:[#allocation10 + $0x38] sm:$0xf]  ;;  %v5405_v16 = vld [vmem:[#allocation10 + $0x3c] sm:$0xf]  ;;  %s6040_s8 = sld [smem:[#allocation29_spill]] }
  0xd6   : > { %s6075_s16 = smov (!%p755_p11, %s6037_s16), 1 }
  0xd7   : > { %s3688_s12 = sshll.u32 %s6075_s16, 3 }
  0xd8   : > { %s5368_s14 = scalar_lea.vmem %s6038_s9, %s3688_s12  ;;  %s763_s30 = scalar_lea.vmem %s6039_s15, %s3688_s12 }
  0xd9   : > { %v5373_v0 = vld [vmem:[%s763_s30] sm:$0x3f] }
  0xda   : > { %p3525_p12 = scmp.ne.s32.totalorder %s6040_s8, 0 }
  0xdb   : > { %s6041_s7 = sld [smem:[#allocation46_spill]] (!%p3525_p12) }
  0xdc   : > { %786 = sbr.rel (%p3525_p12) target bundleno = 984 (0x3d8), region = 128 }
  0xe1   : > { %v5413_v17 = vld [vmem:[%s652_s17] sm:$0xff]   ;;  %v5417_v18 = vld [vmem:[%s652_s17 + $0x8] sm:$0xff]   ;;  %v4979_v21 = vmov 0.0   ;;  %vm4980_vm0 = vmmov 0   ;;  %v5446_v33 = vcombine.low %v5403_v15, %v5405_v16  ;;  %v5454_v34 = vcombine.low %v5399_v13, %v5401_v14 }
  0xe2   : > { %v3707_v19 = vunpack.c.l.bf16 %v5413_v17  ;;  %v3711_v20 = vunpack.c.l.bf16 %v5417_v18  ;;  %3922 = vmatprep.subr.bf16.mxu0 %v4979_v21  ;;  %v4388_v22 = vld [vmem:[#allocation13 + $0x38] sm:$0xff]   ;;  %3938 = vmatprep.mubr.msk.bf16.mxu0 %vm4980_vm0, %v4979_v21  ;;  %v3708_v23 = vunpack.c.h.bf16 %v5413_v17  ;;  %v3712_v24 = vunpack.c.h.bf16 %v5417_v18  ;;  %v4389_v25 = vld [vmem:[#allocation13 + $0x30] sm:$0xff]   ;;  %v4390_v26 = vld [vmem:[#allocation13 + $0x28] sm:$0xff]  }
  0xe3   : > { %3923 = vmatpush3.bf16.msra.mxu0 %v4388_v22  ;;  %3942 = vmatprep.subr.bf16.mxu1 %v4388_v22  ;;  %v4391_v27 = vld [vmem:[#allocation13 + $0x20] sm:$0xff]   ;;  %v4392_v28 = vld [vmem:[#allocation13 + $0x18] sm:$0xff]   ;;  %v4393_v29 = vld [vmem:[#allocation13 + $0x10] sm:$0xff]   ;;  %v5462_v35 = vcombine.low %v5395_v11, %v5397_v12  ;;  %v5485_v52 = vcombine.low %v5391_v9, %v5393_v10  ;;  %v5491_v53 = vcombine.low %v5387_v7, %v5389_v8 }
  0xe4   : > { %795 = vadd.xlane.f32.xlu0 %v3707_v19  ;;  %799 = vadd.xlane.f32.xlu1 %v3711_v20  ;;  %v4394_v30 = vld [vmem:[#allocation13 + $0x8] sm:$0xff]   ;;  %v4395_v31 = vld [vmem:[#allocation13] sm:$0xff]   ;;  %v5497_v54 = vcombine.low %v5383_v5, %v5385_v6  ;;  %v5503_v55 = vcombine.low %v5379_v3, %v5381_v4  ;;  %v5508_v56 = vcombine.low %v5375_v1, %v5377_v2 }
  0xe5   : > { %3924 = vmatprep.subr.bf16.mxu0 %v4979_v21  ;;  %3943 = vmatpush3.bf16.msra.mxu1 %v4388_v22  ;;  %v5442_v32 = vld [vmem:[%s5368_s14] sm:$0xff]  }
  0xe6   : > { %3944 = vmatprep.subr.bf16.mxu1 %v4389_v25 }
  0xe7   : > { %3925 = vmatpush3.bf16.msra.mxu0 %v4389_v25 }
  0xe8   : > { %797 = vadd.xlane.f32.xlu0 %v3708_v23  ;;  %801 = vadd.xlane.f32.xlu1 %v3712_v24 }
  0xe9   : > { %3926 = vmatprep.subr.bf16.mxu0 %v4979_v21  ;;  %3945 = vmatpush3.bf16.msra.mxu1 %v4389_v25 }
  0xea   : > { %3946 = vmatprep.subr.bf16.mxu1 %v4390_v26 }
  0xeb   : > { %3927 = vmatpush3.bf16.msra.mxu0 %v4390_v26 }
  0xec   : > { %3928 = vmatprep.subr.bf16.mxu0 %v4979_v21 }
  0xed   : > { %3947 = vmatpush3.bf16.msra.mxu1 %v4390_v26 }
  0xee   : > { %3948 = vmatprep.subr.bf16.mxu1 %v4391_v27 }
  0xef   : > { %3929 = vmatpush3.bf16.msra.mxu0 %v4391_v27 }
  0xf0   : > { %3930 = vmatprep.subr.bf16.mxu0 %v4979_v21 }
  0xf1   : > { %3949 = vmatpush3.bf16.msra.mxu1 %v4391_v27  ;;  %v841_v27 = vlaneseq }
  0xf2   : > { %3950 = vmatprep.subr.bf16.mxu1 %v4392_v28 }
  0xf3   : > { %3931 = vmatpush3.bf16.msra.mxu0 %v4392_v28 }
  0xf4   : > { %3932 = vmatprep.subr.bf16.mxu0 %v4979_v21 }
  0xf5   : > { %3951 = vmatpush3.bf16.msra.mxu1 %v4392_v28 }
  0xf6   : > { %3952 = vmatprep.subr.bf16.mxu1 %v4393_v29 }
  0xf7   : > { %3933 = vmatpush3.bf16.msra.mxu0 %v4393_v29 }
  0xf8   : > { %3934 = vmatprep.subr.bf16.mxu0 %v4979_v21 }
  0xf9   : > { %3953 = vmatpush3.bf16.msra.mxu1 %v4393_v29 }
  0xfa   : > { %3954 = vmatprep.subr.bf16.mxu1 %v4394_v30 }
  0xfb   : > { %3935 = vmatpush3.bf16.msra.mxu0 %v4394_v30 }
  0xfc   : > { %3936 = vmatprep.subr.bf16.mxu0 %v4979_v21 }
  0xfd   : > { %3955 = vmatpush3.bf16.msra.mxu1 %v4394_v30 }
  0xfe   : > { %3956 = vmatprep.subr.bf16.mxu1 %v4395_v31 }
  0xff   : > { %3937 = vmatpush3.bf16.msra.mxu0 %v4395_v31 }
 0x100   : > { %3962 = vmatprep.subr.bf16.mxu0 %v4979_v21 }
 0x101   : > { %3957 = vmatpush3.bf16.msra.mxu1 %v4395_v31  ;;  %v842_v31 = vshrl.u32 %v841_v27, 7 }
 0x102   : > { %3982 = vmatprep.subr.bf16.mxu1 %v5446_v33  ;;  %3939 = vmatmul.mubr.bf16.vlgmr.msra.gmra.mxu0 %v5442_v32 }
 0x103   : > { %3963 = vmatpush3.bf16.msra.mxu0 %v5446_v33  ;;  %3978 = vmatprep.mubr.msk.bf16.mxu0 %vm4980_vm0, %v4979_v21 }
 0x104   : > { %3964 = vmatprep.subr.bf16.mxu0 %v4979_v21 }
 0x107   : > { %3965 = vmatpush3.bf16.msra.mxu0 %v5454_v34 }
 0x108   : > { %3966 = vmatprep.subr.bf16.mxu0 %v4979_v21 }
 0x10b   : > { %3967 = vmatpush3.bf16.msra.mxu0 %v5462_v35 }
 0x10c   : > { %3968 = vmatprep.subr.bf16.mxu0 %v4979_v21 }
 0x10f   : > { %3969 = vmatpush3.bf16.msra.mxu0 %v5485_v52 }
 0x110   : > { %3970 = vmatprep.subr.bf16.mxu0 %v4979_v21 }
 0x113   : > { %3971 = vmatpush3.bf16.msra.mxu0 %v5491_v53 }
 0x114   : > { %3972 = vmatprep.subr.bf16.mxu0 %v4979_v21 }
 0x117   : > { %3973 = vmatpush3.bf16.msra.mxu0 %v5497_v54 }
 0x118   : > { %3974 = vmatprep.subr.bf16.mxu0 %v4979_v21 }
 0x11b   : > { %3975 = vmatpush3.bf16.msra.mxu0 %v5503_v55 }
 0x11c   : > { %3976 = vmatprep.subr.bf16.mxu0 %v4979_v21 }
 0x11f   : > { %3977 = vmatpush3.bf16.msra.mxu0 %v5508_v56 }
 0x120   : > { %4002 = vmatprep.subr.bf16.mxu0 %v4979_v21 }
 0x16d   : > { %v796_v36 = vpop.xlane.xlu0 %795  ;;  %v800_v37 = vpop.xlane.xlu1 %799 }
 0x16e   : > { %v804_v38 = vmul.f32 0.0078125, %v796_v36  ;;  %v806_v39 = vmul.f32 0.0078125, %v800_v37  ;;  %v840_v36 = vadd.f32 1.0, %v5373_v0  ;;  %v843_v37 = vsub.s32 2, %v842_v31 }
 0x170   : > { %v808_v40 = vsub.f32 %v3707_v19, %v804_v38  ;;  %v5471_v41 = vsub.f32 %v3711_v20, %v806_v39 }
 0x171   : > { %v798_v42 = vpop.xlane.xlu0 %797  ;;  %v802_v43 = vpop.xlane.xlu1 %801 }
 0x172   : > { %v805_v44 = vmul.f32 0.0078125, %v798_v42  ;;  %v812_v45 = vmul.f32 %v808_v40, %v808_v40  ;;  %v807_v46 = vmul.f32 0.0078125, %v802_v43  ;;  %v814_v49 = vmul.f32 %v5471_v41, %v5471_v41 }
 0x173   : > { %v844_v42 = vrot.slane %v840_v36, %v843_v37  ;;  %v851_v43 = vsub.s32 4, %v842_v31 }
 0x174   : > { %v809_v47 = vsub.f32 %v3708_v23, %v805_v44  ;;  %816 = vadd.xlane.f32.xlu0 %v812_v45  ;;  %v5477_v48 = vsub.f32 %v3712_v24, %v807_v46 }
 0x176   : > { %v813_v50 = vmul.f32 %v809_v47, %v809_v47  ;;  %v815_v51 = vmul.f32 %v5477_v48, %v5477_v48 }
 0x178   : > { %820 = vadd.xlane.f32.xlu0 %v814_v49  ;;  %818 = vadd.xlane.f32.xlu1 %v813_v50  ;;  %v852_v50 = vrot.slane %v5373_v0, %v851_v43 }
 0x17c   : > { %822 = vadd.xlane.f32.xlu1 %v815_v51 }
 0x1c2   : > { %v5513_v57 = vpop.f32.mrf.mxu0 }
 0x1c3   : > { %v1056_v59 = vmul.f32 %v5513_v57, %v5513_v57 }
 0x1c4   : > { %v3940_v58 = vpop.f32.mrf.mxu0 }
 0x1c6   : > { %v5517_v60 = vpop.f32.mrf.mxu0 }
 0x1c7   : > { %v1057_v61 = vmul.f32 %v5517_v60, %v5517_v60 }
 0x1c8   : > { %v3941_v62 = vpop.f32.mrf.mxu0 }
 0x1c9   : > { %v1058_v63 = vpack.c.bf16 %v1057_v61, %v1056_v59 }
 0x1cb   : > { %3979 = vmatmul.mubr.bf16.vlgmr.msra.gmra.mxu0 %v1058_v63 }
 0x1cc   : > { %4018 = vmatprep.mubr.msk.bf16.mxu0 %vm4980_vm0, %v4979_v21 }
 0x1fd   : > { %v817_v17 = vpop.xlane.xlu0 %816 }
 0x1fe   : > { %v824_v18 = vmul.f32 0.0078125, %v817_v17 }
 0x200   : > { %v828_v19 = vadd.f32 1e-06, %v824_v18 }
 0x201   : > { %v819_v20 = vpop.xlane.xlu1 %818  ;;  %v821_v22 = vpop.xlane.xlu0 %820 }
 0x202   : > { %4405 = vrsqrt.f32 %v828_v19  ;;  %v825_v23 = vmul.f32 0.0078125, %v819_v20  ;;  %v826_v24 = vmul.f32 0.0078125, %v821_v22 }
 0x204   : > { %v829_v25 = vadd.f32 1e-06, %v825_v23  ;;  %v830_v26 = vadd.f32 1e-06, %v826_v24 }
 0x205   : > { %v823_v28 = vpop.xlane.xlu1 %822 }
 0x206   : > { %4407 = vrsqrt.f32 %v829_v25  ;;  %v827_v29 = vmul.f32 0.0078125, %v823_v28 }
 0x207   : > { %4409 = vrsqrt.f32 %v830_v26 }
 0x208   : > { %v831_v30 = vadd.f32 1e-06, %v827_v29 }
 0x20a   : > { %4411 = vrsqrt.f32 %v831_v30 }
 0x20f   : > { %v4406_v38 = vpop.eup %4405 }
 0x210   : > { %v836_v39 = vmul.f32 %v4406_v38, %v808_v40 }
 0x212   : > { %v845_v49 = vmul.f32 %v844_v42, %v836_v39 }
 0x213   : > { %v4408_v44 = vpop.eup %4407 }
 0x214   : > { %v4410_v45 = vpop.eup %4409  ;;  %v837_v46 = vmul.f32 %v4408_v44, %v809_v47  ;;  %v853_v61 = vadd.f32 %v852_v50, %v845_v49 }
 0x215   : > { %v838_v51 = vmul.f32 %v4410_v45, %v5471_v41  ;;  %v4400_v41 = vld [vmem:[#allocation14 + $0x20] sm:$0xff]  }
 0x216   : > { %v846_v58 = vmul.f32 %v844_v42, %v837_v46 }
 0x217   : > { %v4412_v59 = vpop.eup %4411  ;;  %v847_v17 = vmul.f32 %v844_v42, %v838_v51 }
 0x218   : > { %v854_v62 = vadd.f32 %v852_v50, %v846_v58  ;;  %v839_v63 = vmul.f32 %v4412_v59, %v5477_v48  ;;  %v4401_v48 = vld [vmem:[#allocation14 + $0x18] sm:$0xff]  }
 0x219   : > { %v855_v47 = vadd.f32 %v852_v50, %v847_v17 }
 0x21a   : > { %v5527_v18 = vpack.c.bf16 %v854_v62, %v853_v61  ;;  %v848_v40 = vmul.f32 %v844_v42, %v839_v63 }
 0x21c   : > { %3717 = vst [vmem:[#allocation2] sm:$0xff] %v5527_v18   ;;  %3958 = vmatprep.mubr.bf16.mxu1 %v5527_v18  ;;  %v856_v19 = vadd.f32 %v852_v50, %v848_v40 }
 0x21e   : > { %v5531_v20 = vpack.c.bf16 %v856_v19, %v855_v47 }
 0x220   : > { %3754 = vst [vmem:[#allocation2 + $0x8] sm:$0xff] %v5531_v20   ;;  %3959 = vmatmul.mubr.bf16.vlgmr.msra.gmra.mxu1 %v5531_v20 }
 0x221   : > { %3983 = vmatpush3.bf16.msra.mxu1 %v5446_v33  ;;  %v4397_v33 = vld [vmem:[#allocation14 + $0x38] sm:$0xff]  }
 0x222   : > { %3984 = vmatprep.subr.bf16.mxu1 %v5454_v34  ;;  %4003 = vmatpush3.bf16.msra.mxu0 %v4397_v33 }
 0x223   : > { %4004 = vmatprep.subr.bf16.mxu0 %v4979_v21 }
 0x225   : > { %3985 = vmatpush3.bf16.msra.mxu1 %v5454_v34  ;;  %v4398_v34 = vld [vmem:[#allocation14 + $0x30] sm:$0xff]  }
 0x226   : > { %3986 = vmatprep.subr.bf16.mxu1 %v5462_v35  ;;  %4005 = vmatpush3.bf16.msra.mxu0 %v4398_v34 }
 0x227   : > { %4006 = vmatprep.subr.bf16.mxu0 %v4979_v21 }
 0x229   : > { %3987 = vmatpush3.bf16.msra.mxu1 %v5462_v35  ;;  %v4399_v35 = vld [vmem:[#allocation14 + $0x28] sm:$0xff]  }
 0x22a   : > { %3988 = vmatprep.subr.bf16.mxu1 %v5485_v52  ;;  %4007 = vmatpush3.bf16.msra.mxu0 %v4399_v35 }
 0x22b   : > { %4008 = vmatprep.subr.bf16.mxu0 %v4979_v21 }
 0x22d   : > { %3989 = vmatpush3.bf16.msra.mxu1 %v5485_v52  ;;  %v4402_v52 = vld [vmem:[#allocation14 + $0x10] sm:$0xff]  }
 0x22e   : > { %3990 = vmatprep.subr.bf16.mxu1 %v5491_v53  ;;  %4009 = vmatpush3.bf16.msra.mxu0 %v4400_v41 }
 0x22f   : > { %4010 = vmatprep.subr.bf16.mxu0 %v4979_v21 }
 0x231   : > { %3991 = vmatpush3.bf16.msra.mxu1 %v5491_v53  ;;  %v4403_v53 = vld [vmem:[#allocation14 + $0x8] sm:$0xff]  }
 0x232   : > { %3992 = vmatprep.subr.bf16.mxu1 %v5497_v54  ;;  %4011 = vmatpush3.bf16.msra.mxu0 %v4401_v48 }
 0x233   : > { %4012 = vmatprep.subr.bf16.mxu0 %v4979_v21 }
 0x235   : > { %3993 = vmatpush3.bf16.msra.mxu1 %v5497_v54  ;;  %v4404_v54 = vld [vmem:[#allocation14] sm:$0xff]  }
 0x236   : > { %3994 = vmatprep.subr.bf16.mxu1 %v5503_v55  ;;  %4013 = vmatpush3.bf16.msra.mxu0 %v4402_v52 }
 0x237   : > { %4014 = vmatprep.subr.bf16.mxu0 %v4979_v21 }
 0x239   : > { %3995 = vmatpush3.bf16.msra.mxu1 %v5503_v55 }
 0x23a   : > { %3996 = vmatprep.subr.bf16.mxu1 %v5508_v56  ;;  %4015 = vmatpush3.bf16.msra.mxu0 %v4403_v53 }
 0x23b   : > { %4016 = vmatprep.subr.bf16.mxu0 %v4979_v21 }
 0x23d   : > { %3997 = vmatpush3.bf16.msra.mxu1 %v5508_v56 }
 0x23e   : > { %4022 = vmatprep.subr.bf16.mxu1 %v4397_v33  ;;  %4017 = vmatpush3.bf16.msra.mxu0 %v4404_v54 }
 0x241   : > { %4019 = vmatmul.mubr.bf16.vlgmr.msra.gmra.mxu0 %v5442_v32 }
 0x28b   : > { %v1141_v55 = vpop.f32.mrf.mxu0 }
 0x28c   : > { %v1148_v56 = vmax.f32 %v1141_v55, 1e-24 }
 0x28d   : > { %v3980_v22 = vpop.f32.mrf.mxu0 }
 0x28e   : > { %4413 = vrsqrt.f32 %v1148_v56 }
 0x28f   : > { %v1144_v23 = vpop.f32.mrf.mxu0 }
 0x290   : > { %v1149_v24 = vmax.f32 %v1144_v23, 1e-24 }
 0x291   : > { %v3981_v25 = vpop.f32.mrf.mxu0 }
 0x292   : > { %4415 = vrsqrt.f32 %v1149_v24 }
 0x29b   : > { %v4414_v26 = vpop.eup %4413 }
 0x29c   : > { %v1152_v27 = vmul.f32 %v4414_v26, %v5513_v57 }
 0x29f   : > { %v4416_v28 = vpop.eup %4415 }
 0x2a0   : > { %v1153_v29 = vmul.f32 %v4416_v28, %v5517_v60  ;;  %v3553_v60 = vld [vmem:[%s6041_s7] ss:$0 sm:$0xff] }
 0x2a2   : > { %v3726_v30 = vpack.c.bf16 %v1153_v29, %v1152_v27 }
 0x2a4   : > { %3727 = vst [vmem:[#allocation3] sm:$0xff] %v3726_v30  }
 0x2e0   : > { %v3960_v21 = vpop.f32.mrf.mxu1 }
 0x2e1   : > { %v1166_v42 = vmul.f32 %v3960_v21, %v3960_v21 }
 0x2e2   : > { %v1041_v31 = vpop.f32.mrf.mxu1 }
 0x2e3   : > { %v1164_v38 = vmul.f32 %v1041_v31, %v1041_v31 }
 0x2e4   : > { %v3961_v36 = vpop.f32.mrf.mxu1 }
 0x2e5   : > { %v1167_v32 = vmul.f32 %v3961_v36, %v3961_v36 }
 0x2e6   : > { %v1044_v37 = vpop.f32.mrf.mxu1 }
 0x2e7   : > { %v1165_v39 = vmul.f32 %v1044_v37, %v1044_v37  ;;  %v1169_v44 = vpack.c.bf16 %v1167_v32, %v1166_v42 }
 0x2e9   : > { %v1168_v43 = vpack.c.bf16 %v1165_v39, %v1164_v38 }
 0x2eb   : > { %3998 = vmatprep.mubr.bf16.mxu1 %v1168_v43 }
 0x2ec   : > { %3999 = vmatmul.mubr.bf16.vlgmr.msra.gmra.mxu1 %v1169_v44 }
 0x2ed   : > { %4023 = vmatpush3.bf16.msra.mxu1 %v4397_v33  ;;  %4038 = vmatprep.mubr.bf16.mxu1 %v5527_v18 }
 0x2ee   : > { %4024 = vmatprep.subr.bf16.mxu1 %v4398_v34 }
 0x2f1   : > { %4025 = vmatpush3.bf16.msra.mxu1 %v4398_v34 }
 0x2f2   : > { %4026 = vmatprep.subr.bf16.mxu1 %v4399_v35 }
 0x2f5   : > { %4027 = vmatpush3.bf16.msra.mxu1 %v4399_v35 }
 0x2f6   : > { %4028 = vmatprep.subr.bf16.mxu1 %v4400_v41 }
 0x2f9   : > { %4029 = vmatpush3.bf16.msra.mxu1 %v4400_v41 }
 0x2fa   : > { %4030 = vmatprep.subr.bf16.mxu1 %v4401_v48 }
 0x2fd   : > { %4031 = vmatpush3.bf16.msra.mxu1 %v4401_v48 }
 0x2fe   : > { %4032 = vmatprep.subr.bf16.mxu1 %v4402_v52 }
 0x301   : > { %4033 = vmatpush3.bf16.msra.mxu1 %v4402_v52  ;;  %v1339_v57 = vpop.f32.mrf.mxu0 }
 0x302   : > { %4034 = vmatprep.subr.bf16.mxu1 %v4403_v53  ;;  %v1340_v46 = vadd.f32 %v3553_v60, %v1339_v57 }
 0x303   : > { %v4020_v45 = vpop.f32.mrf.mxu0 }
 0x305   : > { %4035 = vmatpush3.bf16.msra.mxu1 %v4403_v53  ;;  %v1342_v49 = vpop.f32.mrf.mxu0 }
 0x306   : > { %4036 = vmatprep.subr.bf16.mxu1 %v4404_v54  ;;  %v1343_v50 = vadd.f32 %v3553_v60, %v1342_v49 }
 0x307   : > { %v4021_v51 = vpop.f32.mrf.mxu0 }
 0x308   : > { %v3741_v58 = vpack.c.bf16 %v1343_v50, %v1340_v46 }
 0x309   : > { %4037 = vmatpush3.bf16.msra.mxu1 %v4404_v54 }
 0x30a   : > { %3742 = vst [vmem:[#allocation4] sm:$0xff] %v3741_v58  }
 0x30c   : > { %4039 = vmatmul.mubr.bf16.vlgmr.msra.gmra.mxu1 %v5531_v20 }
 0x3ac   : > { %v4000_v59 = vpop.f32.mrf.mxu1 }
 0x3ad   : > { %v1221_v61 = vmax.f32 %v4000_v59, 1e-24 }
 0x3ae   : > { %v1204_v62 = vpop.f32.mrf.mxu1 }
 0x3af   : > { %v1219_v63 = vmax.f32 %v1204_v62, 1e-24  ;;  %4417 = vrsqrt.f32 %v1221_v61 }
 0x3b0   : > { %v4001_v17 = vpop.f32.mrf.mxu1 }
 0x3b1   : > { %v1222_v18 = vmax.f32 %v4001_v17, 1e-24  ;;  %4419 = vrsqrt.f32 %v1219_v63 }
 0x3b2   : > { %v1207_v40 = vpop.f32.mrf.mxu1 }
 0x3b3   : > { %4421 = vrsqrt.f32 %v1222_v18  ;;  %v1220_v47 = vmax.f32 %v1207_v40, 1e-24 }
 0x3b5   : > { %4423 = vrsqrt.f32 %v1220_v47 }
 0x3bc   : > { %v4418_v19 = vpop.eup %4417 }
 0x3bd   : > { %v1229_v34 = vmul.f32 %v4418_v19, %v3960_v21 }
 0x3be   : > { %v4420_v20 = vpop.eup %4419 }
 0x3bf   : > { %v1227_v48 = vmul.f32 %v4420_v20, %v1041_v31 }
 0x3c0   : > { %v4422_v33 = vpop.eup %4421 }
 0x3c1   : > { %v1230_v35 = vmul.f32 %v4422_v33, %v3961_v36 }
 0x3c2   : > { %v4424_v41 = vpop.eup %4423 }
 0x3c3   : > { %v3736_v52 = vpack.c.bf16 %v1230_v35, %v1229_v34  ;;  %v1228_v53 = vmul.f32 %v4424_v41, %v1044_v37 }
 0x3c5   : > { %3756 = vst [vmem:[#allocation3 + $0x10] sm:$0xff] %v3736_v52   ;;  %v3731_v54 = vpack.c.bf16 %v1228_v53, %v1227_v48 }
 0x3c7   : > { %3755 = vst [vmem:[#allocation3 + $0x8] sm:$0xff] %v3731_v54  }
 0x3cc   : > { %v4040_v55 = vpop.f32.mrf.mxu1 }
 0x3cd   : > { %v1389_v23 = vadd.f32 %v4040_v55, %v3553_v60 }
 0x3ce   : > { %v1380_v56 = vpop.f32.mrf.mxu1 }
 0x3cf   : > { %v1381_v26 = vadd.f32 %v3553_v60, %v1380_v56 }
 0x3d0   : > { %v4041_v22 = vpop.f32.mrf.mxu1 }
 0x3d1   : > { %v1392_v24 = vadd.f32 %v4041_v22, %v3553_v60 }
 0x3d2   : > { %v1383_v25 = vpop.f32.mrf.mxu1 }
 0x3d3   : > { %v3751_v27 = vpack.c.bf16 %v1392_v24, %v1389_v23  ;;  %v1384_v28 = vadd.f32 %v3553_v60, %v1383_v25 }
 0x3d5   : > { %3758 = vst [vmem:[#allocation4 + $0x10] sm:$0xff] %v3751_v27   ;;  %v3746_v29 = vpack.c.bf16 %v1384_v28, %v1381_v26 }
 0x3d7   : > { %3757 = vst [vmem:[#allocation4 + $0x8] sm:$0xff] %v3746_v29  }
 0x3d8 PF: > { %v4425_v30 = vld [vmem:[#allocation11 + $0x38] sm:$0xff]   ;;  %s6042_s17 = sld [smem:[#allocation29_spill]]  ;;  %v3587_v21 = vcombine.low %v5403_v15, %v5405_v16  ;;  %v4981_v31 = vmov 0.0   ;;  %v4426_v36 = vld [vmem:[#allocation11 + $0x30] sm:$0xff]   ;;  %vm4982_vm1 = vmmov 0   ;;  %v3586_v32 = vcombine.low %v5399_v13, %v5401_v14  ;;  %v4427_v15 = vld [vmem:[#allocation11 + $0x28] sm:$0xff]  }
 0x3d9   : > { %4042 = vmatprep.subr.bf16.mxu0 %v4981_v31  ;;  %4062 = vmatprep.subr.bf16.mxu1 %v4981_v31  ;;  %v3585_v16 = vcombine.low %v5395_v11, %v5397_v12  ;;  %v4428_v37 = vld [vmem:[#allocation11 + $0x20] sm:$0xff]   ;;  %v3584_v13 = vcombine.low %v5391_v9, %v5393_v10  ;;  %v4429_v14 = vld [vmem:[#allocation11 + $0x18] sm:$0xff]   ;;  %v3583_v11 = vcombine.low %v5387_v7, %v5389_v8  ;;  %v4430_v12 = vld [vmem:[#allocation11 + $0x10] sm:$0xff]   ;;  %s6043_s5 = sld [smem:[#allocation43_spill]]  ;;  %vm1681_vm2 = vcmask 261120   ;;  %s4983_s13 = smov 96  }
 0x3da   : > { %4043 = vmatpush3.bf16.msra.mxu0 %v4425_v30  ;;  %4058 = vmatprep.mubr.msk.bf16.mxu0 %vm4982_vm1, %v4981_v31  ;;  %v4431_v38 = vld [vmem:[#allocation11 + $0x8] sm:$0xff]   ;;  %v4432_v9 = vld [vmem:[#allocation11] sm:$0xff]   ;;  %v3582_v7 = vcombine.low %v5383_v5, %v5385_v6  ;;  %v3581_v8 = vcombine.low %v5379_v3, %v5381_v4  ;;  %v3580_v39 = vcombine.low %v5375_v1, %v5377_v2  ;;  %v5616_v46 = vld [vmem:[#allocation3 + $0x8] sm:$0xff]   ;;  %s6044_s11 = sld [smem:[#allocation40_spill]]  ;;  %vm1735_vm3 = vcmask 392192   ;;  %s4984_s15 = smov 64  }
 0x3db   : > { %4044 = vmatprep.subr.bf16.mxu0 %v4981_v31  ;;  %4063 = vmatpush3.bf16.msra.mxu1 %v3587_v21  ;;  %v5611_v1 = vld [vmem:[#allocation3 + $0x10] sm:$0xff]   ;;  %v1689_v49 = vsel %vm1681_vm2, %v5616_v46, 0  ;;  %v5621_v50 = vld [vmem:[#allocation3] sm:$0xff]   ;;  %s4985_s30 = smov 32   ;;  %s6045_s23 = sld [smem:[#allocation48_spill]] }
 0x3dc   : > { %4064 = vmatprep.subr.bf16.mxu1 %v4981_v31  ;;  %4078 = vmatprep.mubr.msk.bf16.mxu1 %vm4982_vm1, %v4981_v31  ;;  %v1692_v2 = vsel %vm1681_vm2, %v5611_v1, 0  ;;  %v1686_v51 = vsel %vm1681_vm2, %v5621_v50, 0  ;;  %v5641_v21 = vld [vmem:[#allocation4 + $0x10] sm:$0xff]   ;;  %s6046_s7 = sld [smem:[#allocation50_spill]]  ;;  %s3288_s14 = sshll.u32 %s5408_s20, 4  ;;  %s5872_s14 = int_to_ptr.vmem [resolvable:$true] %s3288_s14 }
 0x3dd   : > { %s5883_s8 = scalar_lea.sflag [#allocation7], %s659_s21  ;;  %s4822_s10 = scalar_lea.vmem %s5872_s14, 256 }
 0x3de   : > { %s3568_s24 = sshll.u32 %s6042_s17, 4  ;;  %4045 = vmatpush3.bf16.msra.mxu0 %v4426_v36  ;;  %v5647_v36 = vld [vmem:[#allocation4 + $0x8] sm:$0xff]   ;;  %s3682_s12 = sshll.u32 %s6042_s17, 1 }
 0x3df   : > { %s1428_s0 = sshra.s32 %s3568_s24, 3  ;;  %4046 = vmatprep.subr.bf16.mxu0 %v4981_v31  ;;  %4065 = vmatpush3.bf16.msra.mxu1 %v3586_v32  ;;  %v3570_v42 = vld [vmem:[%s6043_s5] ss:$0 sm:$0xff]  ;;  %v5653_v32 = vld [vmem:[#allocation4] sm:$0xff]   ;;  %s6047_s24 = sld [smem:[#allocation30_spill]] }
 0x3e0   : > { %s3569_s2 = sshll.u32 %s1428_s0, 2  ;;  %4066 = vmatprep.subr.bf16.mxu1 %v4981_v31  ;;  %v3588_v19 = vld [vmem:[%s6044_s11] ss:$0 sm:$0xff]  ;;  %s6049_s5 = sld [smem:[#allocation33_spill]] }
 0x3e1   : > { %s1431_s16 = scalar_lea.vmem [#allocation2], %s3569_s2  ;;  %p4823_p13 = scmp.ne.s32.totalorder %s5872_s14, %s4822_s10 }
 0x3e2   : > { %4047 = vmatpush3.bf16.msra.mxu0 %v4427_v15  ;;  %v4433_v10 = vld [vmem:[%s1431_s16] sm:$0xff]   ;;  %s6048_s16 = sld [smem:[#allocation52_spill]] }
 0x3e3   : > { %4048 = vmatprep.subr.bf16.mxu0 %v4981_v31  ;;  %4067 = vmatpush3.bf16.msra.mxu1 %v3585_v16 }
 0x3e4   : > { %4068 = vmatprep.subr.bf16.mxu1 %v4981_v31 }
 0x3e5   : > { %s3683_s6 = sshll.u32 %s6047_s24, 2 }
 0x3e6   : > { %4049 = vmatpush3.bf16.msra.mxu0 %v4428_v37  ;;  %s3285_s9 = sadd.s32 %s3683_s6, %s3682_s12  ;;  %p6051_p8 = scmp.ne.s32.totalorder %s6049_s5, 0 }
 0x3e7   : > { %4050 = vmatprep.subr.bf16.mxu0 %v4981_v31  ;;  %4069 = vmatpush3.bf16.msra.mxu1 %v3584_v13  ;;  %s3684_s11 = sshll.u32 %s3285_s9, 7 }
 0x3e8   : > { %4070 = vmatprep.subr.bf16.mxu1 %v4981_v31  ;;  %p4824_p1 = pnand %p4823_p13, %p6051_p8 }
 0x3ea   : > { %4051 = vmatpush3.bf16.msra.mxu0 %v4429_v14  ;;  %p4825_p0 = pneg %p4824_p1 }
 0x3eb   : > { %4052 = vmatprep.subr.bf16.mxu0 %v4981_v31  ;;  %4071 = vmatpush3.bf16.msra.mxu1 %v3583_v11 }
 0x3ec   : > { %4072 = vmatprep.subr.bf16.mxu1 %v4981_v31 }
 0x3ee   : > { %4053 = vmatpush3.bf16.msra.mxu0 %v4430_v12 }
 0x3ef   : > { %4054 = vmatprep.subr.bf16.mxu0 %v4981_v31  ;;  %4073 = vmatpush3.bf16.msra.mxu1 %v3582_v7 }
 0x3f0   : > { %4074 = vmatprep.subr.bf16.mxu1 %v4981_v31 }
 0x3f2   : > { %4055 = vmatpush3.bf16.msra.mxu0 %v4431_v38 }
 0x3f3   : > { %4056 = vmatprep.subr.bf16.mxu0 %v4981_v31  ;;  %4075 = vmatpush3.bf16.msra.mxu1 %v3581_v8 }
 0x3f4   : > { %4076 = vmatprep.subr.bf16.mxu1 %v4981_v31 }
 0x3f6   : > { %4057 = vmatpush3.bf16.msra.mxu0 %v4432_v9 }
 0x3f7   : > { %4082 = vmatprep.subr.bf16.mxu0 %v4981_v31  ;;  %4077 = vmatpush3.bf16.msra.mxu1 %v3580_v39 }
 0x3f8   : > { %4092 = vmatprep.subr.bf16.mxu1 %v4981_v31 }
 0x3f9   : > { %4059 = vmatmul.mubr.bf16.vlgmr.msra.gmra.mxu0 %v4433_v10 }
 0x3fa   : > { %4088 = vmatprep.mubr.msk.bf16.mxu0 %vm4982_vm1, %v4981_v31  ;;  %4083 = vmatpush3.bf16.xpose.msra.mxu0 %v1692_v2 }
 0x3fb   : > { %4084 = vmatprep.subr.bf16.mxu0 %v4981_v31 }
 0x402   : > { %4085 = vmatpush3.bf16.xpose.msra.mxu0 %v1689_v49 }
 0x403   : > { %4086 = vmatprep.subr.bf16.mxu0 %v4981_v31 }
 0x40a   : > { %4087 = vmatpush3.bf16.xpose.msra.mxu0 %v1686_v51 }
 0x40b   : > { %4112 = vmatprep.subr.bf16.mxu0 %v4981_v31 }
 0x4b9   : > { %v1545_v5 = vpop.f32.mrf.mxu0 }
 0x4ba   : > { %v1546_v43 = vadd.f32 %v3570_v42, %v1545_v5  ;;  %v4440_v5 = vld [vmem:[#allocation16 + $0x8] sm:$0xff]  }
 0x4bb   : > { %v4060_v6 = vpop.f32.mrf.mxu0 }
 0x4bc   : > { %v1552_v3 = vmul.f32 %v1546_v43, %v1546_v43  ;;  %v4441_v6 = vld [vmem:[#allocation16] sm:$0xff]  }
 0x4bd   : > { %v1548_v44 = vpop.f32.mrf.mxu0 }
 0x4be   : > { %v1549_v57 = vadd.f32 %v3570_v42, %v1548_v44 }
 0x4bf   : > { %v4061_v60 = vpop.f32.mrf.mxu0 }
 0x4c0   : > { %v1553_v4 = vmul.f32 %v1549_v57, %v1549_v57 }
 0x4c2   : > { %v1554_v45 = vpack.c.bf16 %v1553_v4, %v1552_v3 }
 0x4c4   : > { %4079 = vmatmul.mubr.bf16.vlgmr.msra.gmra.mxu1 %v1554_v45 }
 0x4c5   : > { %4098 = vmatprep.mubr.msk.bf16.mxu1 %vm4982_vm1, %v4981_v31  ;;  %4093 = vmatpush3.bf16.msra.mxu1 %v5641_v21 }
 0x4c6   : > { %4094 = vmatprep.subr.bf16.mxu1 %v4981_v31 }
 0x4c9   : > { %4095 = vmatpush3.bf16.msra.mxu1 %v5647_v36 }
 0x4ca   : > { %4096 = vmatprep.subr.bf16.mxu1 %v4981_v31 }
 0x4cd   : > { %4097 = vmatpush3.bf16.msra.mxu1 %v5653_v32 }
 0x4ce   : > { %4102 = vmatprep.subr.bf16.mxu1 %v4981_v31 }
 0x584   : > { %v1637_v58 = vpop.f32.mrf.mxu1 }
 0x585   : > { %v1644_v59 = vmax.f32 %v1637_v58, 1e-24 }
 0x586   : > { %v4080_v61 = vpop.f32.mrf.mxu1 }
 0x587   : > { %4528 = vrsqrt.f32 %v1644_v59 }
 0x588   : > { %v1640_v62 = vpop.f32.mrf.mxu1 }
 0x589   : > { %v1645_v63 = vmax.f32 %v1640_v62, 1e-24 }
 0x58a   : > { %v4081_v17 = vpop.f32.mrf.mxu1 }
 0x58b   : > { %4530 = vrsqrt.f32 %v1645_v63 }
 0x594   : > { %v4529_v18 = vpop.eup %4528 }
 0x595   : > { %v1648_v40 = vmul.f32 %v4529_v18, %v1546_v43 }
 0x597   : > { %v1657_v33 = vmul.f32 %v3588_v19, %v1648_v40 }
 0x598   : > { %v4531_v47 = vpop.eup %4530 }
 0x599   : > { %v1649_v20 = vmul.f32 %v4531_v47, %v1549_v57 }
 0x59b   : > { %v1658_v34 = vmul.f32 %v3588_v19, %v1649_v20 }
 0x59d   : > { %v5629_v35 = vpack.c.bf16 %v1658_v34, %v1657_v33 }
 0x59f   : > { %4089 = vmatmul.mubr.msk.bf16.vlgmr.msra.gmra.mxu0 %vm1681_vm2, %v5629_v35 }
 0x5a0   : > { %4118 = vmatprep.mubr.msk.bf16.mxu0 %vm4982_vm1, %v4981_v31 }
 0x65f   : > { %v1728_v41 = vpop.f32.mrf.mxu0 }
 0x660   : > { %v1736_v48 = vsel %vm1735_vm3, %v1728_v41, -inf }
 0x661   : > { %1737 = vmax.xlane.f32.xlu0 %v1736_v48  ;;  %v4090_v52 = vpop.f32.mrf.mxu0 }
 0x663   : > { %v1731_v53 = vpop.f32.mrf.mxu0 }
 0x664   : > { %v1739_v54 = vsel %vm1735_vm3, %v1731_v53, -inf }
 0x665   : > { %1740 = vmax.xlane.f32.xlu0 %v1739_v54  ;;  %v4091_v55 = vpop.f32.mrf.mxu0 }
 0x67b   : > { %1839 = vrot.lane.b32.xlu0 %v5611_v1, %s4983_s13 }
 0x6ea   : > { %v1738_v56 = vpop.xlane.xlu0 %1737 }
 0x6eb   : > { %v1742_v22 = vsub.f32 %v1728_v41, %v1738_v56 }
 0x6ed   : > { %v1744_v23 = vmul.f32 1.442695, %v1742_v22 }
 0x6ee   : > { %v1741_v24 = vpop.xlane.xlu0 %1740 }
 0x6ef   : > { %4532 = vpow2.f32 %v1744_v23  ;;  %v1743_v25 = vsub.f32 %v1731_v53, %v1741_v24 }
 0x6f1   : > { %v1746_v26 = vmul.f32 1.442695, %v1743_v25 }
 0x6f2   : > { %v1840_v14 = vpop.permute.xlu0 %1839 }
 0x6f3   : > { %4534 = vpow2.f32 %v1746_v26  ;;  %v1851_v38 = vsel %vm1681_vm2, %v1840_v14, 0  ;;  %v4442_v26 = vld [vmem:[#allocation16 + $0x18] sm:$0xff]  }
 0x6fc   : > { %v4533_v27 = vpop.eup %4532 }
 0x6fd   : > { %v1748_v28 = vsel %vm1735_vm3, %v4533_v27, 0.0 }
 0x6fe   : > { %1749 = vadd.xlane.f32.xlu1 %v1748_v28  ;;  %v4443_v28 = vld [vmem:[#allocation16 + $0x10] sm:$0xff]  }
 0x700   : > { %v4535_v29 = vpop.eup %4534 }
 0x701   : > { %v1751_v30 = vsel %vm1735_vm3, %v4535_v29, 0.0 }
 0x702   : > { %1752 = vadd.xlane.f32.xlu1 %v1751_v30 }
 0x713   : > { %1837 = vrot.lane.b32.xlu1 %v5616_v46, %s4983_s13 }
 0x717   : > { %1835 = vrot.lane.b32.xlu1 %v5621_v50, %s4983_s13 }
 0x71b   : > { %1833 = vrot.lane.b32.xlu1 %v5629_v35, %s4983_s13 }
 0x787   : > { %v1750_v15 = vpop.xlane.xlu1 %1749 }
 0x788   : > { %4536 = vrcp.f32 %v1750_v15 }
 0x78b   : > { %v1753_v16 = vpop.xlane.xlu1 %1752 }
 0x78c   : > { %4538 = vrcp.f32 %v1753_v16 }
 0x78f   : > { %v1838_v10 = vpop.permute.xlu1 %1837 }
 0x790   : > { %v1848_v7 = vsel %vm1681_vm2, %v1838_v10, 0 }
 0x793   : > { %v1836_v8 = vpop.permute.xlu1 %1835 }
 0x794   : > { %v1845_v39 = vsel %vm1681_vm2, %v1836_v8, 0 }
 0x795   : > { %v4537_v37 = vpop.eup %4536 }
 0x796   : > { %v1756_v11 = vmul.f32 %v4537_v37, %v4533_v27 }
 0x797   : > { %v1834_v42 = vpop.permute.xlu1 %1833 }
 0x799   : > { %v4539_v13 = vpop.eup %4538 }
 0x79a   : > { %v1757_v12 = vmul.f32 %v4539_v13, %v4535_v29 }
 0x79c   : > { %v1758_v9 = vpack.c.bf16 %v1757_v12, %v1756_v11 }
 0x79e   : > { %4099 = vmatmul.mubr.msk.bf16.vlgmr.msra.gmra.mxu1 %vm1735_vm3, %v1758_v9 }
 0x79f   : > { %4103 = vmatpush3.bf16.xpose.msra.mxu1 %v1851_v38  ;;  %4108 = vmatprep.mubr.msk.bf16.mxu1 %vm4982_vm1, %v4981_v31 }
 0x7a0   : > { %4104 = vmatprep.subr.bf16.mxu1 %v4981_v31 }
 0x7a7   : > { %4105 = vmatpush3.bf16.xpose.msra.mxu1 %v1848_v7 }
 0x7a8   : > { %4106 = vmatprep.subr.bf16.mxu1 %v4981_v31 }
 0x7af   : > { %4107 = vmatpush3.bf16.xpose.msra.mxu1 %v1845_v39 }
 0x7b0   : > { %4130 = vmatprep.subr.bf16.mxu1 %v4981_v31 }
 0x7b6   : > { %4109 = vmatmul.mubr.msk.bf16.vlgmr.msra.gmra.mxu1 %vm1681_vm2, %v1834_v42 }
 0x7b7   : > { %4134 = vmatprep.mubr.msk.bf16.mxu1 %vm4982_vm1, %v4981_v31  ;;  %4131 = vmatpush3.bf16.msra.mxu1 %v4440_v5 }
 0x7b8   : > { %4132 = vmatprep.subr.bf16.mxu1 %v4981_v31 }
 0x7bb   : > { %4133 = vmatpush3.bf16.msra.mxu1 %v4441_v6 }
 0x7bc   : > { %4148 = vmatprep.subr.bf16.mxu1 %v4981_v31 }
 0x85e   : > { %v1820_v43 = vpop.f32.mrf.mxu1 }
 0x860   : > { %v4100_v44 = vpop.f32.mrf.mxu1 }
 0x862   : > { %v1823_v57 = vpop.f32.mrf.mxu1 }
 0x863   : > { %v1827_v60 = vpack.c.bf16 %v1823_v57, %v1820_v43 }
 0x864   : > { %v4101_v3 = vpop.f32.mrf.mxu1 }
 0x865   : > { %4135 = vmatmul.mubr.msk.bf16.vlgmr.msra.gmra.mxu1 %vm1681_vm2, %v1827_v60 }
 0x866   : > { %4154 = vmatprep.mubr.msk.bf16.mxu1 %vm4982_vm1, %v4981_v31 }
 0x876   : > { %v1887_v4 = vpop.f32.mrf.mxu1 }
 0x877   : > { %v1894_v45 = vsel %vm1735_vm3, %v1887_v4, -inf }
 0x878   : > { %1895 = vmax.xlane.f32.xlu0 %v1894_v45  ;;  %v4110_v2 = vpop.f32.mrf.mxu1 }
 0x87a   : > { %v1890_v49 = vpop.f32.mrf.mxu1 }
 0x87b   : > { %v1897_v51 = vsel %vm1735_vm3, %v1890_v49, -inf }
 0x87c   : > { %1898 = vmax.xlane.f32.xlu1 %v1897_v51  ;;  %v4111_v58 = vpop.f32.mrf.mxu1 }
 0x88d   : > { %1919 = vrot.lane.b32.xlu1 %v5647_v36, %s4983_s13 }
 0x891   : > { %1917 = vrot.lane.b32.xlu1 %v5653_v32, %s4983_s13 }
 0x895   : > { %2093 = vrot.lane.b32.xlu1 %v5611_v1, %s4984_s15 }
 0x899   : > { %2089 = vrot.lane.b32.xlu1 %v5621_v50, %s4984_s15 }
 0x901   : > { %v1896_v59 = vpop.xlane.xlu0 %1895 }
 0x902   : > { %v1900_v61 = vsub.f32 %v1887_v4, %v1896_v59 }
 0x904   : > { %v1902_v62 = vmul.f32 1.442695, %v1900_v61 }
 0x905   : > { %v1899_v63 = vpop.xlane.xlu1 %1898 }
 0x906   : > { %4540 = vpow2.f32 %v1902_v62  ;;  %v1901_v17 = vsub.f32 %v1890_v49, %v1899_v63 }
 0x908   : > { %v1904_v18 = vmul.f32 1.442695, %v1901_v17 }
 0x909   : > { %v1920_v55 = vpop.permute.xlu1 %1919 }
 0x90a   : > { %4542 = vpow2.f32 %v1904_v18 }
 0x90d   : > { %v1918_v56 = vpop.permute.xlu1 %1917 }
 0x911   : > { %v2094_v15 = vpop.permute.xlu1 %2093 }
 0x912   : > { %v2105_v13 = vsel %vm1681_vm2, %v2094_v15, 0 }
 0x913   : > { %v4541_v40 = vpop.eup %4540 }
 0x914   : > { %v1906_v47 = vsel %vm1735_vm3, %v4541_v40, 0.0 }
 0x915   : > { %1907 = vadd.xlane.f32.xlu0 %v1906_v47  ;;  %v2090_v38 = vpop.permute.xlu1 %2089 }
 0x916   : > { %v2099_v9 = vsel %vm1681_vm2, %v2090_v38, 0 }
 0x917   : > { %v4543_v19 = vpop.eup %4542 }
 0x918   : > { %v1909_v20 = vsel %vm1735_vm3, %v4543_v19, 0.0 }
 0x919   : > { %1910 = vadd.xlane.f32.xlu0 %v1909_v20  ;;  %v4444_v20 = vld [vmem:[#allocation16 + $0x28] sm:$0xff]  }
 0x925   : > { %v5688_v33 = vpop.f32.mrf.mxu1 }
 0x927   : > { %v4136_v34 = vpop.f32.mrf.mxu1 }
 0x929   : > { %v5690_v41 = vpop.f32.mrf.mxu1 }
 0x92b   : > { %v4137_v48 = vpop.f32.mrf.mxu1 }
 0x92f   : > { %1921 = vrot.lane.b32.xlu0 %v5641_v21, %s4983_s13 }
 0x933   : > { %2091 = vrot.lane.b32.xlu0 %v5616_v46, %s4984_s15 }
 0x937   : > { %2087 = vrot.lane.b32.xlu0 %v5629_v35, %s4984_s15 }
 0x99e   : > { %v1908_v52 = vpop.xlane.xlu0 %1907 }
 0x99f   : > { %4544 = vrcp.f32 %v1908_v52 }
 0x9a2   : > { %v1911_v53 = vpop.xlane.xlu0 %1910 }
 0x9a3   : > { %4546 = vrcp.f32 %v1911_v53 }
 0x9a6   : > { %v1922_v54 = vpop.permute.xlu0 %1921 }
 0x9a7   : > { %4113 = vmatpush3.bf16.msra.mxu0 %v1922_v54 }
 0x9a8   : > { %4114 = vmatprep.subr.bf16.mxu0 %v4981_v31 }
 0x9aa   : > { %v2092_v11 = vpop.permute.xlu0 %2091 }
 0x9ab   : > { %4115 = vmatpush3.bf16.msra.mxu0 %v1920_v55  ;;  %v2102_v12 = vsel %vm1681_vm2, %v2092_v11, 0 }
 0x9ac   : > { %4116 = vmatprep.subr.bf16.mxu0 %v4981_v31  ;;  %v4545_v22 = vpop.eup %4544 }
 0x9ad   : > { %v1914_v24 = vmul.f32 %v4545_v22, %v4541_v40 }
 0x9ae   : > { %v2088_v10 = vpop.permute.xlu0 %2087 }
 0x9af   : > { %4117 = vmatpush3.bf16.msra.mxu0 %v1918_v56 }
 0x9b0   : > { %v4547_v23 = vpop.eup %4546  ;;  %4122 = vmatprep.subr.bf16.mxu0 %v4981_v31 }
 0x9b1   : > { %v1915_v25 = vmul.f32 %v4547_v23, %v4543_v19 }
 0x9b3   : > { %v1916_v27 = vpack.c.bf16 %v1915_v25, %v1914_v24 }
 0x9b5   : > { %4119 = vmatmul.mubr.msk.bf16.vlgmr.msra.gmra.mxu0 %vm1735_vm3, %v1916_v27 }
 0x9b6   : > { %4123 = vmatpush3.bf16.msra.mxu0 %v4442_v26  ;;  %4126 = vmatprep.mubr.msk.bf16.mxu0 %vm4982_vm1, %v4981_v31 }
 0x9b7   : > { %4124 = vmatprep.subr.bf16.mxu0 %v4981_v31 }
 0x9ba   : > { %4125 = vmatpush3.bf16.msra.mxu0 %v4443_v28 }
 0x9bb   : > { %4138 = vmatprep.subr.bf16.mxu0 %v4981_v31 }
 0xa75   : > { %v1963_v29 = vpop.f32.mrf.mxu0 }
 0xa77   : > { %v4120_v30 = vpop.f32.mrf.mxu0 }
 0xa79   : > { %v1966_v16 = vpop.f32.mrf.mxu0 }
 0xa7a   : > { %v1970_v37 = vpack.c.bf16 %v1966_v16, %v1963_v29 }
 0xa7b   : > { %v4121_v14 = vpop.f32.mrf.mxu0 }
 0xa7c   : > { %4127 = vmatmul.mubr.msk.bf16.vlgmr.msra.gmra.mxu0 %vm1681_vm2, %v1970_v37 }
 0xa7d   : > { %4139 = vmatpush3.bf16.xpose.msra.mxu0 %v2105_v13  ;;  %4144 = vmatprep.mubr.msk.bf16.mxu0 %vm4982_vm1, %v4981_v31 }
 0xa7e   : > { %4140 = vmatprep.subr.bf16.mxu0 %v4981_v31 }
 0xa85   : > { %4141 = vmatpush3.bf16.xpose.msra.mxu0 %v2102_v12 }
 0xa86   : > { %4142 = vmatprep.subr.bf16.mxu0 %v4981_v31 }
 0xa8d   : > { %4143 = vmatpush3.bf16.xpose.msra.mxu0 %v2099_v9 }
 0xa8e   : > { %4176 = vmatprep.subr.bf16.mxu0 %v4981_v31 }
 0xa94   : > { %4145 = vmatmul.mubr.msk.bf16.vlgmr.msra.gmra.mxu0 %vm1681_vm2, %v2088_v10 }
 0xa95   : > { %4182 = vmatprep.mubr.msk.bf16.mxu0 %vm4982_vm1, %v4981_v31 }
 0xb3c   : > { %v5718_v7 = vpop.f32.mrf.mxu0 }
 0xb3d   : > { %v2081_v28 = vadd.f32 %v5688_v33, %v5718_v7 }
 0xb3e   : > { %v4128_v8 = vpop.f32.mrf.mxu0 }
 0xb40   : > { %v5720_v39 = vpop.f32.mrf.mxu0 }
 0xb41   : > { %v2084_v16 = vadd.f32 %v5690_v41, %v5720_v39 }
 0xb42   : > { %v4129_v42 = vpop.f32.mrf.mxu0 }
 0xb54   : > { %v2141_v5 = vpop.f32.mrf.mxu0 }
 0xb55   : > { %v2148_v6 = vsel %vm1735_vm3, %v2141_v5, -inf }
 0xb56   : > { %2149 = vmax.xlane.f32.xlu1 %v2148_v6  ;;  %v4146_v43 = vpop.f32.mrf.mxu0 }
 0xb58   : > { %v2144_v44 = vpop.f32.mrf.mxu0 }
 0xb59   : > { %v2151_v57 = vsel %vm1735_vm3, %v2144_v44, -inf }
 0xb5a   : > { %2152 = vmax.xlane.f32.xlu0 %v2151_v57  ;;  %v4147_v60 = vpop.f32.mrf.mxu0 }
 0xb67   : > { %2175 = vrot.lane.b32.xlu1 %v5641_v21, %s4984_s15 }
 0xb6b   : > { %2171 = vrot.lane.b32.xlu1 %v5653_v32, %s4984_s15 }
 0xb6f   : > { %2293 = vrot.lane.b32.xlu1 %v5611_v1, %s4985_s30 }
 0xb73   : > { %2291 = vrot.lane.b32.xlu1 %v5616_v46, %s4985_s30 }
 0xb77   : > { %2287 = vrot.lane.b32.xlu1 %v5629_v35, %s4985_s30 }
 0xbdf   : > { %v2150_v3 = vpop.xlane.xlu1 %2149 }
 0xbe0   : > { %v2154_v4 = vsub.f32 %v2141_v5, %v2150_v3 }
 0xbe2   : > { %v2156_v45 = vmul.f32 1.442695, %v2154_v4 }
 0xbe3   : > { %v2176_v2 = vpop.permute.xlu1 %2175  ;;  %v2153_v49 = vpop.xlane.xlu0 %2152 }
 0xbe4   : > { %4548 = vpow2.f32 %v2156_v45  ;;  %v2155_v51 = vsub.f32 %v2144_v44, %v2153_v49  ;;  %4149 = vmatpush3.bf16.msra.mxu1 %v2176_v2 }
 0xbe5   : > { %4150 = vmatprep.subr.bf16.mxu1 %v4981_v31 }
 0xbe6   : > { %v2158_v58 = vmul.f32 1.442695, %v2155_v51  ;;  %v4446_v51 = vld [vmem:[#allocation16 + $0x38] sm:$0xff]  }
 0xbe7   : > { %v2172_v17 = vpop.permute.xlu1 %2171 }
 0xbe8   : > { %4550 = vpow2.f32 %v2158_v58 }
 0xbeb   : > { %v2294_v53 = vpop.permute.xlu1 %2293 }
 0xbec   : > { %v2305_v55 = vsel %vm1681_vm2, %v2294_v53, 0 }
 0xbef   : > { %v2292_v23 = vpop.permute.xlu1 %2291 }
 0xbf0   : > { %v2302_v24 = vsel %vm1681_vm2, %v2292_v23, 0 }
 0xbf1   : > { %v4549_v59 = vpop.eup %4548 }
 0xbf2   : > { %v2160_v1 = vsel %vm1735_vm3, %v4549_v59, 0.0 }
 0xbf3   : > { %2161 = vadd.xlane.f32.xlu0 %v2160_v1  ;;  %v2288_v27 = vpop.permute.xlu1 %2287 }
 0xbf5   : > { %v4551_v46 = vpop.eup %4550 }
 0xbf6   : > { %v2163_v61 = vsel %vm1735_vm3, %v4551_v46, 0.0 }
 0xbf7   : > { %2164 = vadd.xlane.f32.xlu0 %v2163_v61 }
 0xc0d   : > { %2173 = vrot.lane.b32.xlu0 %v5647_v36, %s4984_s15  ;;  %s6050_s15 = sld [smem:[#allocation53_spill]] }
 0xc11   : > { %2289 = vrot.lane.b32.xlu0 %v5621_v50, %s4985_s30  ;;  %v4445_v50 = vld [vmem:[#allocation16 + $0x20] sm:$0xff]  }
 0xc7c   : > { %v2162_v35 = vpop.xlane.xlu0 %2161 }
 0xc7d   : > { %4552 = vrcp.f32 %v2162_v35 }
 0xc80   : > { %v2165_v62 = vpop.xlane.xlu0 %2164 }
 0xc81   : > { %4554 = vrcp.f32 %v2165_v62 }
 0xc84   : > { %v2174_v63 = vpop.permute.xlu0 %2173 }
 0xc85   : > { %4151 = vmatpush3.bf16.msra.mxu1 %v2174_v63  ;;  %v2496_v63 = vlaneseq }
 0xc86   : > { %4152 = vmatprep.subr.bf16.mxu1 %v4981_v31 }
 0xc88   : > { %v2290_v25 = vpop.permute.xlu0 %2289 }
 0xc89   : > { %4153 = vmatpush3.bf16.msra.mxu1 %v2172_v17  ;;  %v2299_v26 = vsel %vm1681_vm2, %v2290_v25, 0  ;;  %v5783_v17 = vshrl.u32 %v2496_v63, 7  ;;  %v4448_v25 = vld [vmem:[#allocation17 + $0xe0] ss:$16 sps:$4 sm:$0xff]  }
 0xc8a   : > { %4158 = vmatprep.subr.bf16.mxu1 %v4981_v31  ;;  %v4553_v18 = vpop.eup %4552 }
 0xc8b   : > { %v2168_v47 = vmul.f32 %v4553_v18, %v4549_v59  ;;  %v4447_v59 = vld [vmem:[#allocation16 + $0x30] sm:$0xff]   ;;  %v2498_v18 = vsub.s32 0, %v5783_v17 }
 0xc8e   : > { %v4555_v40 = vpop.eup %4554 }
 0xc8f   : > { %v2169_v19 = vmul.f32 %v4555_v40, %v4551_v46 }
 0xc91   : > { %v2170_v34 = vpack.c.bf16 %v2169_v19, %v2168_v47  ;;  %v2499_v19 = vrot.slane %v5373_v0, %v2498_v18 }
 0xc93   : > { %4155 = vmatmul.mubr.msk.bf16.vlgmr.msra.gmra.mxu1 %vm1735_vm3, %v2170_v34 }
 0xc94   : > { %4159 = vmatpush3.bf16.msra.mxu1 %v4444_v20  ;;  %4162 = vmatprep.mubr.msk.bf16.mxu1 %vm4982_vm1, %v4981_v31 }
 0xc95   : > { %4160 = vmatprep.subr.bf16.mxu1 %v4981_v31 }
 0xc98   : > { %4161 = vmatpush3.bf16.msra.mxu1 %v4445_v50 }
 0xc99   : > { %4166 = vmatprep.subr.bf16.mxu1 %v4981_v31 }
 0xd53   : > { %v2217_v48 = vpop.f32.mrf.mxu1 }
 0xd55   : > { %v4156_v52 = vpop.f32.mrf.mxu1 }
 0xd57   : > { %v2220_v54 = vpop.f32.mrf.mxu1 }
 0xd58   : > { %v2224_v56 = vpack.c.bf16 %v2220_v54, %v2217_v48  ;;  %v1426_v48 = vld [vmem:[%s661_s22] sm:$0xff] }
 0xd59   : > { %v4157_v22 = vpop.f32.mrf.mxu1 }
 0xd5a   : > { %4163 = vmatmul.mubr.msk.bf16.vlgmr.msra.gmra.mxu1 %vm1681_vm2, %v2224_v56  ;;  %v1427_v22 = vld [vmem:[%s661_s22 + $0x8] sm:$0xff] }
 0xd5b   : > { %4167 = vmatpush3.bf16.xpose.msra.mxu1 %v2305_v55  ;;  %4172 = vmatprep.mubr.msk.bf16.mxu1 %vm4982_vm1, %v4981_v31 }
 0xd5c   : > { %4168 = vmatprep.subr.bf16.mxu1 %v4981_v31 }
 0xd63   : > { %4169 = vmatpush3.bf16.xpose.msra.mxu1 %v2302_v24 }
 0xd64   : > { %4170 = vmatprep.subr.bf16.mxu1 %v4981_v31 }
 0xd6b   : > { %4171 = vmatpush3.bf16.xpose.msra.mxu1 %v2299_v26  ;;  %v4450_v26 = vld [vmem:[#allocation17 + $0xe4] ss:$16 sps:$4 sm:$0xff]  }
 0xd72   : > { %4173 = vmatmul.mubr.msk.bf16.vlgmr.msra.gmra.mxu1 %vm1681_vm2, %v2288_v27  ;;  %v4451_v27 = vld [vmem:[#allocation17 + $0xe8] ss:$16 sps:$4 sm:$0xff]  }
 0xe1a   : > { %v2278_v29 = vpop.f32.mrf.mxu1 }
 0xe1b   : > { %v5759_v30 = vadd.f32 %v2278_v29, %v2081_v28  ;;  %v4453_v28 = vld [vmem:[#allocation17 + $0xec] ss:$16 sps:$4 sm:$0xff]  }
 0xe1c   : > { %v4164_v15 = vpop.f32.mrf.mxu1  ;;  %2798 = vmatprep.subr.bf16.mxu1 %v4453_v28  ;;  %v4497_v28 = vld [vmem:[#allocation19 + $0xf8] sm:$0xff]  }
 0xe1d   : > { %2799 = vmatpush1.bf16.msra.mxu1 %v4451_v27  ;;  %v4496_v27 = vld [vmem:[#allocation19 + $0x78] sm:$0xff]  }
 0xe1e   : > { %v2281_v37 = vpop.f32.mrf.mxu1 }
 0xe1f   : > { %v5763_v13 = vadd.f32 %v2281_v37, %v2084_v16 }
 0xe20   : > { %v4165_v14 = vpop.f32.mrf.mxu1 }
 0xe32   : > { %v2341_v11 = vpop.f32.mrf.mxu1 }
 0xe33   : > { %v2348_v12 = vsel %vm1735_vm3, %v2341_v11, -inf }
 0xe34   : > { %2349 = vmax.xlane.f32.xlu0 %v2348_v12  ;;  %v4174_v38 = vpop.f32.mrf.mxu1  ;;  %v4456_v12 = vld [vmem:[#allocation17 + $0xc4] ss:$16 sps:$4 sm:$0xff]  }
 0xe35   : > { %v4459_v38 = vld [vmem:[#allocation17 + $0xcc] ss:$16 sps:$4 sm:$0xff]  }
 0xe36   : > { %v2344_v9 = vpop.f32.mrf.mxu1  ;;  %2800 = vmatprep.subr.bf16.mxu1 %v4459_v38  ;;  %v4507_v38 = vld [vmem:[#allocation19 + $0xa8] sm:$0xff]  }
 0xe37   : > { %v2351_v10 = vsel %vm1735_vm3, %v2344_v9, -inf }
 0xe38   : > { %2352 = vmax.xlane.f32.xlu1 %v2351_v10  ;;  %v4175_v33 = vpop.f32.mrf.mxu1  ;;  %v4457_v10 = vld [vmem:[#allocation17 + $0xc8] ss:$16 sps:$4 sm:$0xff]  }
 0xe39   : > { %2801 = vmatpush1.bf16.msra.mxu1 %v4457_v10  ;;  %v4462_v33 = vld [vmem:[#allocation17 + $0xa4] ss:$16 sps:$4 sm:$0xff]  }
 0xe3a   : > { %v4509_v10 = vld [vmem:[#allocation19 + $0xe0] sm:$0xff]  }
 0xe49   : > { %2373 = vrot.lane.b32.xlu1 %v5647_v36, %s4985_s30 }
 0xe4d   : > { %2371 = vrot.lane.b32.xlu1 %v5653_v32, %s4985_s30 }
 0xebd   : > { %v2350_v41 = vpop.xlane.xlu0 %2349 }
 0xebe   : > { %v2354_v7 = vsub.f32 %v2341_v11, %v2350_v41  ;;  %v4465_v41 = vld [vmem:[#allocation17 + $0xac] ss:$16 sps:$4 sm:$0xff]  }
 0xebf   : > { %2802 = vmatprep.subr.bf16.mxu1 %v4465_v41  ;;  %v4511_v41 = vld [vmem:[#allocation19 + $0xa0] sm:$0xff]  }
 0xec0   : > { %v2356_v8 = vmul.f32 1.442695, %v2354_v7  ;;  %v4460_v7 = vld [vmem:[#allocation17 + $0xa0] ss:$16 sps:$4 sm:$0xff]  }
 0xec1   : > { %v2353_v39 = vpop.xlane.xlu1 %2352 }
 0xec2   : > { %4556 = vpow2.f32 %v2356_v8  ;;  %v2355_v42 = vsub.f32 %v2344_v9, %v2353_v39  ;;  %v4454_v9 = vld [vmem:[#allocation17 + $0xc0] ss:$16 sps:$4 sm:$0xff]   ;;  %v4463_v8 = vld [vmem:[#allocation17 + $0xa8] ss:$16 sps:$4 sm:$0xff]  }
 0xec3   : > { %2803 = vmatpush1.bf16.msra.mxu1 %v4463_v8  ;;  %v4466_v39 = vld [vmem:[#allocation17 + $0x80] ss:$16 sps:$4 sm:$0xff]   ;;  %v4513_v8 = vld [vmem:[#allocation19 + $0xd8] sm:$0xff]  }
 0xec4   : > { %v2358_v5 = vmul.f32 1.442695, %v2355_v42  ;;  %v4468_v42 = vld [vmem:[#allocation17 + $0x84] ss:$16 sps:$4 sm:$0xff]  }
 0xec5   : > { %v2374_v3 = vpop.permute.xlu1 %2373 }
 0xec6   : > { %4558 = vpow2.f32 %v2358_v5  ;;  %v4469_v5 = vld [vmem:[#allocation17 + $0x88] ss:$16 sps:$4 sm:$0xff]  }
 0xec9   : > { %v2372_v4 = vpop.permute.xlu1 %2371 }
 0xecf   : > { %v4557_v6 = vpop.eup %4556 }
 0xed0   : > { %v2360_v43 = vsel %vm1735_vm3, %v4557_v6, 0.0 }
 0xed1   : > { %2361 = vadd.xlane.f32.xlu0 %v2360_v43  ;;  %v4474_v43 = vld [vmem:[#allocation17 + $0x64] ss:$16 sps:$4 sm:$0xff]  }
 0xed3   : > { %v4559_v44 = vpop.eup %4558 }
 0xed4   : > { %v2363_v57 = vsel %vm1735_vm3, %v4559_v44, 0.0 }
 0xed5   : > { %2364 = vadd.xlane.f32.xlu0 %v2363_v57  ;;  %v4472_v57 = vld [vmem:[#allocation17 + $0x60] ss:$16 sps:$4 sm:$0xff]  }
 0xeeb   : > { %2375 = vrot.lane.b32.xlu0 %v5641_v21, %s4985_s30  ;;  %s5878_s30 = scalar_lea.hbm %s6050_s15, %s3684_s11 }
 0xf5a   : > { %v2362_v36 = vpop.xlane.xlu0 %2361 }
 0xf5b   : > { %4560 = vrcp.f32 %v2362_v36  ;;  %v4475_v36 = vld [vmem:[#allocation17 + $0x68] ss:$16 sps:$4 sm:$0xff]  }
 0xf5e   : > { %v2365_v32 = vpop.xlane.xlu0 %2364 }
 0xf5f   : > { %4562 = vrcp.f32 %v2365_v32  ;;  %v4480_v32 = vld [vmem:[#allocation17 + $0x44] ss:$16 sps:$4 sm:$0xff]  }
 0xf62   : > { %v2376_v60 = vpop.permute.xlu0 %2375 }
 0xf63   : > { %4177 = vmatpush3.bf16.msra.mxu0 %v2376_v60  ;;  %v4483_v60 = vld [vmem:[#allocation17 + $0x4c] ss:$16 sps:$4 sm:$0xff]  }
 0xf64   : > { %4178 = vmatprep.subr.bf16.mxu0 %v4981_v31 }
 0xf67   : > { %4179 = vmatpush3.bf16.msra.mxu0 %v2374_v3  ;;  %v4478_v3 = vld [vmem:[#allocation17 + $0x40] ss:$16 sps:$4 sm:$0xff]  }
 0xf68   : > { %4180 = vmatprep.subr.bf16.mxu0 %v4981_v31  ;;  %v4561_v45 = vpop.eup %4560 }
 0xf69   : > { %v2368_v49 = vmul.f32 %v4561_v45, %v4557_v6  ;;  %v4471_v6 = vld [vmem:[#allocation17 + $0x8c] ss:$16 sps:$4 sm:$0xff]   ;;  %v4481_v45 = vld [vmem:[#allocation17 + $0x48] ss:$16 sps:$4 sm:$0xff]  }
 0xf6a   : > { %2804 = vmatprep.subr.bf16.mxu1 %v4471_v6  ;;  %v4517_v6 = vld [vmem:[#allocation19 + $0xd0] sm:$0xff]  }
 0xf6b   : > { %4181 = vmatpush3.bf16.msra.mxu0 %v2372_v4  ;;  %2805 = vmatpush1.bf16.msra.mxu1 %v4469_v5  ;;  %v4986_v4 = vmov 0   ;;  %v4516_v5 = vld [vmem:[#allocation19 + $0x50] sm:$0xff]  }
 0xf6c   : > { %v4563_v2 = vpop.eup %4562  ;;  %4186 = vmatprep.subr.bf16.mxu0 %v4981_v31  ;;  %2830 = vmatprep.mubr.bf16.mxu1 %v4986_v4 }
 0xf6d   : > { %v2369_v21 = vmul.f32 %v4563_v2, %v4559_v44  ;;  %v4477_v44 = vld [vmem:[#allocation17 + $0x6c] ss:$16 sps:$4 sm:$0xff]   ;;  %v4486_v2 = vld [vmem:[#allocation17 + $0x24] ss:$16 sps:$4 sm:$0xff]  }
 0xf6e   : > { %2806 = vmatprep.subr.bf16.mxu1 %v4477_v44  ;;  %v4519_v44 = vld [vmem:[#allocation19 + $0x90] sm:$0xff]  }
 0xf6f   : > { %v2370_v58 = vpack.c.bf16 %v2369_v21, %v2368_v49  ;;  %2807 = vmatpush1.bf16.msra.mxu1 %v4475_v36  ;;  %v4489_v49 = vld [vmem:[#allocation17 + $0x2c] ss:$16 sps:$4 sm:$0xff]   ;;  %v4484_v21 = vld [vmem:[#allocation17 + $0x20] ss:$16 sps:$4 sm:$0xff]  }
 0xf70   : > { %2808 = vmatprep.subr.bf16.mxu1 %v4483_v60  ;;  %v4521_v36 = vld [vmem:[#allocation19 + $0xc8] sm:$0xff]  }
 0xf71   : > { %4183 = vmatmul.mubr.msk.bf16.vlgmr.msra.gmra.mxu0 %vm1735_vm3, %v2370_v58  ;;  %v4492_v58 = vld [vmem:[#allocation17 + $0x4] ss:$16 sps:$4 sm:$0xff]   ;;  %v4523_v60 = vld [vmem:[#allocation19 + $0x88] sm:$0xff]  }
 0xf72   : > { %4187 = vmatpush3.bf16.msra.mxu0 %v4446_v51  ;;  %4190 = vmatprep.mubr.msk.bf16.mxu0 %vm4982_vm1, %v4981_v31  ;;  %v4487_v51 = vld [vmem:[#allocation17 + $0x28] ss:$16 sps:$4 sm:$0xff]  }
 0xf73   : > { %4188 = vmatprep.subr.bf16.mxu0 %v4981_v31  ;;  %v3615_v31 = vld [vmem:[%s6045_s23] ss:$0 sm:$0xff]  ;;  %2809 = vmatpush1.bf16.msra.mxu1 %v4481_v45  ;;  %s4987_s23 = smov [#allocation20]  }
 0xf74   : > { %2810 = vmatprep.subr.bf16.mxu1 %v4489_v49  ;;  %v4526_v45 = vld [vmem:[#allocation19] sm:$0xff]   ;;  %v2585_v49 = vsub.s32 2, %v5783_v17  ;;  %s4826_s4 = sshll.u32 %s4987_s23, 4  ;;  %s4827_s4 = int_to_ptr.vmem [resolvable:$false] %s4826_s4 }
 0xf75   : > { %s4828_s22 = scalar_lea.vmem %s4827_s4, 512  ;;  %p4829_p3 = scmp.lt.s32.totalorder %s5872_s14, %s4827_s4 }
 0xf76   : > { %4189 = vmatpush3.bf16.msra.mxu0 %v4447_v59  ;;  %v4495_v59 = vld [vmem:[#allocation17 + $0xc] ss:$16 sps:$4 sm:$0xff]   ;;  %p4830_p7 = scmp.lt.s32.totalorder %s4828_s22, %s4822_s10 }
 0xf77   : > { %2755 = vmatprep.subr.bf16.mxu0 %v4450_v26  ;;  %2811 = vmatpush1.bf16.msra.mxu1 %v4487_v51  ;;  %v2581_v51 = vsub.s32 1, %v5783_v17 }
 0xf78   : > { %2812 = vmatprep.subr.bf16.mxu1 %v4495_v59  ;;  %p4831_p10 = por %p4830_p7, %p4829_p3 }
 0xf7a   : > { %p4832_p5 = pnand %p4831_p10, %p4825_p0 }
0x1031   : > { %v2417_v1 = vpop.f32.mrf.mxu0 }
0x1033   : > { %v4184_v46 = vpop.f32.mrf.mxu0 }
0x1034   : > { %v4493_v46 = vld [vmem:[#allocation17 + $0x8] ss:$16 sps:$4 sm:$0xff]  }
0x1035   : > { %v2420_v61 = vpop.f32.mrf.mxu0  ;;  %2813 = vmatpush1.bf16.msra.mxu1 %v4493_v46 }
0x1036   : > { %v2424_v35 = vpack.c.bf16 %v2420_v61, %v2417_v1  ;;  %v4490_v1 = vld [vmem:[#allocation17] ss:$16 sps:$4 sm:$0xff]   ;;  %3900 = vmatprep.subr.bf16.mxu1 %v4497_v28 }
0x1037   : > { %v4185_v62 = vpop.f32.mrf.mxu0 }
0x1038   : > { %4191 = vmatmul.mubr.msk.bf16.vlgmr.msra.gmra.mxu0 %vm1681_vm2, %v2424_v35 }
0x1039   : > { %2756 = vmatpush1.bf16.msra.mxu0 %v4448_v25  ;;  %2787 = vmatprep.mubr.bf16.mxu0 %v4986_v4  ;;  %v4525_v4 = vld [vmem:[#allocation19 + $0xc0] sm:$0xff]  }
0x103a   : > { %2757 = vmatprep.subr.bf16.mxu0 %v4456_v12  ;;  %v4506_v12 = vld [vmem:[#allocation19 + $0x28] sm:$0xff]  }
0x103d   : > { %2758 = vmatpush1.bf16.msra.mxu0 %v4454_v9  ;;  %v4508_v9 = vld [vmem:[#allocation19 + $0x60] sm:$0xff]  }
0x103e   : > { %2759 = vmatprep.subr.bf16.mxu0 %v4462_v33  ;;  %v4510_v33 = vld [vmem:[#allocation19 + $0x20] sm:$0xff]  }
0x1041   : > { %2760 = vmatpush1.bf16.msra.mxu0 %v4460_v7  ;;  %v4512_v7 = vld [vmem:[#allocation19 + $0x58] sm:$0xff]  }
0x1042   : > { %2761 = vmatprep.subr.bf16.mxu0 %v4468_v42  ;;  %v4515_v42 = vld [vmem:[#allocation19 + $0x98] sm:$0xff]  }
0x1045   : > { %2762 = vmatpush1.bf16.msra.mxu0 %v4466_v39  ;;  %v4514_v39 = vld [vmem:[#allocation19 + $0x18] sm:$0xff]  }
0x1046   : > { %2763 = vmatprep.subr.bf16.mxu0 %v4474_v43  ;;  %v4518_v43 = vld [vmem:[#allocation19 + $0x10] sm:$0xff]  }
0x1049   : > { %2764 = vmatpush1.bf16.msra.mxu0 %v4472_v57  ;;  %v4520_v57 = vld [vmem:[#allocation19 + $0x48] sm:$0xff]  }
0x104a   : > { %2765 = vmatprep.subr.bf16.mxu0 %v4480_v32  ;;  %v4522_v32 = vld [vmem:[#allocation19 + $0x8] sm:$0xff]  }
0x104d   : > { %2766 = vmatpush1.bf16.msra.mxu0 %v4478_v3  ;;  %v4524_v3 = vld [vmem:[#allocation19 + $0x40] sm:$0xff]  }
0x104e   : > { %2767 = vmatprep.subr.bf16.mxu0 %v4486_v2  ;;  %v4527_v2 = vld [vmem:[#allocation19 + $0x80] sm:$0xff]  }
0x1051   : > { %2768 = vmatpush1.bf16.msra.mxu0 %v4484_v21  ;;  %v2573_v21 = vld [vmem:[%s6046_s7] sm:$0xf] }
0x1052   : > { %2769 = vmatprep.subr.bf16.mxu0 %v4492_v58  ;;  %v2578_v58 = vrot.slane %v2573_v21, %v2498_v18  ;;  %v2586_v59 = vrot.slane %v2573_v21, %v2585_v49 }
0x1055   : > { %2770 = vmatpush1.bf16.msra.mxu0 %v4490_v1  ;;  %v2582_v1 = vrot.slane %v2573_v21, %v2581_v51 }
0x1056   : > { %3878 = vmatprep.subr.bf16.mxu0 %v4496_v27 }
0x10f8   : > { %v2478_v40 = vpop.f32.mrf.mxu0 }
0x10f9   : > { %v2485_v47 = vadd.f32 %v2478_v40, %v5759_v30 }
0x10fa   : > { %v4192_v20 = vpop.f32.mrf.mxu0 }
0x10fb   : > { %v2494_v34 = vadd.f32 %v3615_v31, %v2485_v47  ;;  %v2527_v47 = vadd.f32 1.0, %v5373_v0 }
0x10fc   : > { %v2481_v50 = vpop.f32.mrf.mxu0 }
0x10fd   : > { %v2500_v52 = vmul.f32 %v2499_v19, %v2494_v34  ;;  %v2486_v53 = vadd.f32 %v2481_v50, %v5763_v13 }
0x10fe   : > { %v4193_v54 = vpop.f32.mrf.mxu0 }
0x10ff   : > { %v2495_v55 = vadd.f32 %v3615_v31, %v2486_v53  ;;  %v5796_v56 = vadd.f32 %v2500_v52, %v1426_v48  ;;  %v2536_v48 = vsub.s32 5, %v5783_v17 }
0x1101   : > { %v2501_v23 = vmul.f32 %v2499_v19, %v2495_v55  ;;  %2504 = vadd.xlane.f32.xlu1 %v5796_v56  ;;  %v2530_v19 = vsub.s32 3, %v5783_v17  ;;  %v2537_v55 = vrot.slane %v5373_v0, %v2536_v48 }
0x1103   : > { %v5801_v24 = vadd.f32 %v2501_v23, %v1427_v22  ;;  %v2531_v50 = vrot.slane %v2527_v47, %v2530_v19  ;;  %v2590_v46 = vrot.slane %v2573_v21, %v2530_v19 }
0x1105   : > { %2506 = vadd.xlane.f32.xlu0 %v5801_v24 }
0x118a   : > { %v2505_v29 = vpop.xlane.xlu1 %2504 }
0x118b   : > { %v2509_v30 = vmul.f32 0.0078125, %v2505_v29  ;;  %v4498_v29 = vld [vmem:[#allocation19 + $0x38] sm:$0xff]  }
0x118d   : > { %v5805_v15 = vsub.f32 %v5796_v56, %v2509_v30  ;;  %v4499_v30 = vld [vmem:[#allocation19 + $0xb8] sm:$0xff]  }
0x118e   : > { %v2507_v16 = vpop.xlane.xlu0 %2506 }
0x118f   : > { %v2510_v37 = vmul.f32 0.0078125, %v2507_v16  ;;  %v2513_v13 = vmul.f32 %v5805_v15, %v5805_v15  ;;  %v4501_v16 = vld [vmem:[#allocation19 + $0xf0] sm:$0xff]  }
0x1191   : > { %v5810_v14 = vsub.f32 %v5801_v24, %v2510_v37  ;;  %2515 = vadd.xlane.f32.xlu0 %v2513_v13  ;;  %v4502_v37 = vld [vmem:[#allocation19 + $0x30] sm:$0xff]  }
0x1192   : > { %v4503_v13 = vld [vmem:[#allocation19 + $0xb0] sm:$0xff]  }
0x1193   : > { %v2514_v11 = vmul.f32 %v5810_v14, %v5810_v14 }
0x1195   : > { %2517 = vadd.xlane.f32.xlu0 %v2514_v11  ;;  %v4505_v11 = vld [vmem:[#allocation19 + $0xe8] sm:$0xff]  }
0x121a   : > { %v2516_v61 = vpop.xlane.xlu0 %2515 }
0x121b   : > { %v2519_v35 = vmul.f32 0.0078125, %v2516_v61 }
0x121d   : > { %v2521_v62 = vadd.f32 1e-06, %v2519_v35 }
0x121e   : > { %v2518_v63 = vpop.xlane.xlu0 %2517 }
0x121f   : > { %4564 = vrsqrt.f32 %v2521_v62  ;;  %v2520_v40 = vmul.f32 0.0078125, %v2518_v63 }
0x1221   : > { %v2522_v31 = vadd.f32 1e-06, %v2520_v40 }
0x1223   : > { %4566 = vrsqrt.f32 %v2522_v31 }
0x122c   : > { %v4565_v20 = vpop.eup %4564 }
0x122d   : > { %v2525_v34 = vmul.f32 %v4565_v20, %v5805_v15  ;;  %v4500_v15 = vld [vmem:[#allocation19 + $0x70] sm:$0xff]  }
0x122f   : > { %v2532_v54 = vmul.f32 %v2531_v50, %v2525_v34 }
0x1230   : > { %v4567_v52 = vpop.eup %4566 }
0x1231   : > { %v2526_v53 = vmul.f32 %v4567_v52, %v5810_v14  ;;  %v2538_v23 = vadd.f32 %v2537_v55, %v2532_v54  ;;  %v4504_v14 = vld [vmem:[#allocation19 + $0x68] sm:$0xff]  }
0x1233   : > { %v2533_v22 = vmul.f32 %v2531_v50, %v2526_v53 }
0x1235   : > { %v2539_v25 = vadd.f32 %v2537_v55, %v2533_v22 }
0x1237   : > { %v2540_v26 = vpack.c.bf16 %v2539_v25, %v2538_v23 }
0x1239   : > { %2788 = vmatmul.mubr.bf16.vlgmr.msra.gmra.mxu0 %v2540_v26  ;;  %2831 = vmatmul.mubr.bf16.vlgmr.msra.gmra.mxu1 %v2540_v26 }
0x123a   : > { %3879 = vmatpush3.bf16.msra.mxu0 %v4498_v29  ;;  %3901 = vmatpush3.bf16.msra.mxu1 %v4499_v30 }
0x123b   : > { %3880 = vmatprep.subr.bf16.mxu0 %v4500_v15  ;;  %3902 = vmatprep.subr.bf16.mxu1 %v4501_v16 }
0x123e   : > { %3881 = vmatpush3.bf16.msra.mxu0 %v4502_v37  ;;  %3903 = vmatpush3.bf16.msra.mxu1 %v4503_v13 }
0x123f   : > { %3882 = vmatprep.subr.bf16.mxu0 %v4504_v14  ;;  %3904 = vmatprep.subr.bf16.mxu1 %v4505_v11 }
0x1242   : > { %3883 = vmatpush3.bf16.msra.mxu0 %v4506_v12  ;;  %3905 = vmatpush3.bf16.msra.mxu1 %v4507_v38 }
0x1243   : > { %3884 = vmatprep.subr.bf16.mxu0 %v4508_v9  ;;  %3906 = vmatprep.subr.bf16.mxu1 %v4509_v10 }
0x1246   : > { %3885 = vmatpush3.bf16.msra.mxu0 %v4510_v33  ;;  %3907 = vmatpush3.bf16.msra.mxu1 %v4511_v41 }
0x1247   : > { %3886 = vmatprep.subr.bf16.mxu0 %v4512_v7  ;;  %3908 = vmatprep.subr.bf16.mxu1 %v4513_v8 }
0x124a   : > { %3887 = vmatpush3.bf16.msra.mxu0 %v4514_v39  ;;  %3909 = vmatpush3.bf16.msra.mxu1 %v4515_v42 }
0x124b   : > { %3888 = vmatprep.subr.bf16.mxu0 %v4516_v5  ;;  %3910 = vmatprep.subr.bf16.mxu1 %v4517_v6 }
0x124e   : > { %3889 = vmatpush3.bf16.msra.mxu0 %v4518_v43  ;;  %3911 = vmatpush3.bf16.msra.mxu1 %v4519_v44 }
0x124f   : > { %3890 = vmatprep.subr.bf16.mxu0 %v4520_v57  ;;  %3912 = vmatprep.subr.bf16.mxu1 %v4521_v36 }
0x1252   : > { %3891 = vmatpush3.bf16.msra.mxu0 %v4522_v32  ;;  %3913 = vmatpush3.bf16.msra.mxu1 %v4523_v60 }
0x1253   : > { %3892 = vmatprep.subr.bf16.mxu0 %v4524_v3  ;;  %3914 = vmatprep.subr.bf16.mxu1 %v4525_v4 }
0x1256   : > { %3893 = vmatpush3.bf16.msra.mxu0 %v4526_v45  ;;  %3915 = vmatpush3.bf16.msra.mxu1 %v4527_v2 }
0x12f9   : > { %v2789_v61 = vpop.f32.mrf.mxu0  ;;  %v2832_v35 = vpop.f32.mrf.mxu1 }
0x12fa   : > { %v5833_v62 = vadd.f32 %v2789_v61, %v2578_v58  ;;  %v5835_v63 = vadd.f32 %v2832_v35, %v2586_v59 }
0x12fb   : > { %v2791_v40 = vpop.f32.mrf.mxu0  ;;  %v2834_v31 = vpop.f32.mrf.mxu1 }
0x12fc   : > { %v2849_v47 = vmul.f32 0.044715, %v5833_v62  ;;  %v2851_v20 = vmul.f32 0.044715, %v5835_v63  ;;  %v2792_v18 = vadd.f32 %v2791_v40, %v2582_v1  ;;  %v5839_v34 = vadd.f32 %v2834_v31, %v2590_v46 }
0x12fd   : > { %v2793_v50 = vpop.f32.mrf.mxu0  ;;  %v2836_v48 = vpop.f32.mrf.mxu1 }
0x12fe   : > { %v2857_v52 = vmul.f32 %v2849_v47, %v5833_v62  ;;  %v2859_v19 = vmul.f32 %v2851_v20, %v5835_v63  ;;  %v2850_v53 = vmul.f32 0.044715, %v2792_v18  ;;  %v2852_v54 = vmul.f32 0.044715, %v5839_v34 }
0x12ff   : > { %v2794_v55 = vadd.f32 %v2793_v50, %v2578_v58  ;;  %v5844_v22 = vadd.f32 %v2836_v48, %v2586_v59  ;;  %v2795_v23 = vpop.f32.mrf.mxu0  ;;  %v2838_v25 = vpop.f32.mrf.mxu1  ;;  %v2842_v31 = vmul.f32 0.5, %v2792_v18  ;;  %v2841_v20 = vmul.f32 0.5, %v5833_v62 }
0x1300   : > { %v2865_v26 = vmul.f32 %v2857_v52, %v5833_v62  ;;  %v2867_v27 = vmul.f32 %v2859_v19, %v5835_v63  ;;  %v2858_v28 = vmul.f32 %v2850_v53, %v2792_v18  ;;  %v2860_v29 = vmul.f32 %v2852_v54, %v5839_v34 }
0x1301   : > { %v2853_v30 = vmul.f32 0.044715, %v2794_v55  ;;  %v2855_v15 = vmul.f32 0.044715, %v5844_v22  ;;  %v2796_v16 = vadd.f32 %v2795_v23, %v2582_v1  ;;  %v2839_v37 = vadd.f32 %v2838_v25, %v2590_v46 }
0x1302   : > { %v2873_v13 = vadd.f32 %v2865_v26, %v5833_v62  ;;  %v2875_v14 = vadd.f32 %v2867_v27, %v5835_v63  ;;  %v2866_v11 = vmul.f32 %v2858_v28, %v2792_v18  ;;  %v2868_v12 = vmul.f32 %v2860_v29, %v5839_v34 }
0x1303   : > { %v2861_v38 = vmul.f32 %v2853_v30, %v2794_v55  ;;  %v2863_v9 = vmul.f32 %v2855_v15, %v5844_v22  ;;  %v2854_v10 = vmul.f32 0.044715, %v2796_v16  ;;  %v2856_v33 = vmul.f32 0.044715, %v2839_v37 }
0x1304   : > { %v2881_v41 = vmul.f32 0.7978846, %v2873_v13  ;;  %v2883_v7 = vmul.f32 0.7978846, %v2875_v14  ;;  %v2874_v8 = vadd.f32 %v2866_v11, %v2792_v18  ;;  %v2876_v44 = vadd.f32 %v2868_v12, %v5839_v34 }
0x1305   : > { %v2869_v39 = vmul.f32 %v2861_v38, %v2794_v55  ;;  %v2871_v42 = vmul.f32 %v2863_v9, %v5844_v22  ;;  %v2862_v5 = vmul.f32 %v2854_v10, %v2796_v16  ;;  %v2864_v6 = vmul.f32 %v2856_v33, %v2839_v37 }
0x1306   : > { %v2882_v43 = vmul.f32 0.7978846, %v2874_v8  ;;  %4568 = vtanh.f32 %v2881_v41  ;;  %v2884_v3 = vmul.f32 0.7978846, %v2876_v44  ;;  %v2845_v19 = vmul.f32 0.5, %v2794_v55 }
0x1307   : > { %v2877_v57 = vadd.f32 %v2869_v39, %v2794_v55  ;;  %v2879_v36 = vadd.f32 %v2871_v42, %v5844_v22  ;;  %v2870_v32 = vmul.f32 %v2862_v5, %v2796_v16  ;;  %4570 = vtanh.f32 %v2883_v7 }
0x1308   : > { %v2872_v60 = vmul.f32 %v2864_v6, %v2839_v37  ;;  %4572 = vtanh.f32 %v2882_v43  ;;  %v2846_v25 = vmul.f32 0.5, %v2796_v16  ;;  %v2847_v27 = vmul.f32 0.5, %v5844_v22 }
0x1309   : > { %v2885_v4 = vmul.f32 0.7978846, %v2877_v57  ;;  %v2887_v45 = vmul.f32 0.7978846, %v2879_v36  ;;  %v2878_v2 = vadd.f32 %v2870_v32, %v2796_v16  ;;  %4574 = vtanh.f32 %v2884_v3 }
0x130a   : > { %v2880_v49 = vadd.f32 %v2872_v60, %v2839_v37  ;;  %v2844_v29 = vmul.f32 0.5, %v5839_v34  ;;  %v2848_v30 = vmul.f32 0.5, %v2839_v37  ;;  %v2843_v62 = vmul.f32 0.5, %v5835_v63  ;;  %v3648_v63 = vld [vmem:[%s6048_s16] ss:$0 sm:$0xff] }
0x130b   : > { %4576 = vtanh.f32 %v2885_v4  ;;  %v2886_v21 = vmul.f32 0.7978846, %v2878_v2  ;;  %v3265_v6 = vrot.slane %v5373_v0, %v2581_v51 }
0x130c   : > { %4578 = vtanh.f32 %v2887_v45  ;;  %v2888_v58 = vmul.f32 0.7978846, %v2880_v49 }
0x130d   : > { %4580 = vtanh.f32 %v2886_v21 }
0x130e   : > { %4582 = vtanh.f32 %v2888_v58 }
0x1313   : > { %v4569_v59 = vpop.eup %4568 }
0x1314   : > { %v4571_v1 = vpop.eup %4570  ;;  %v2897_v53 = vadd.f32 1.0, %v4569_v59 }
0x1315   : > { %v4573_v46 = vpop.eup %4572  ;;  %v2899_v28 = vadd.f32 1.0, %v4571_v1 }
0x1316   : > { %v4575_v61 = vpop.eup %4574  ;;  %v2898_v47 = vadd.f32 1.0, %v4573_v46  ;;  %v2905_v38 = vmul.f32 %v2897_v53, %v2841_v20 }
0x1317   : > { %v2900_v52 = vadd.f32 1.0, %v4575_v61  ;;  %v2907_v10 = vmul.f32 %v2899_v28, %v2843_v62 }
0x1318   : > { %v4577_v35 = vpop.eup %4576  ;;  %v2906_v13 = vmul.f32 %v2898_v47, %v2842_v31 }
0x1319   : > { %v4579_v40 = vpop.eup %4578  ;;  %v2901_v50 = vadd.f32 1.0, %v4577_v35  ;;  %v2908_v12 = vmul.f32 %v2900_v52, %v2844_v29 }
0x131a   : > { %v4581_v48 = vpop.eup %4580  ;;  %v2903_v54 = vadd.f32 1.0, %v4579_v40 }
0x131b   : > { %v4583_v23 = vpop.eup %4582  ;;  %v2902_v26 = vadd.f32 1.0, %v4581_v48  ;;  %v2909_v18 = vmul.f32 %v2901_v50, %v2845_v19 }
0x131c   : > { %v2904_v15 = vadd.f32 1.0, %v4583_v23  ;;  %v2911_v11 = vmul.f32 %v2903_v54, %v2847_v27 }
0x131d   : > { %v2910_v14 = vmul.f32 %v2902_v26, %v2846_v25  ;;  %v2913_v33 = vpack.c.bf16 %v2909_v18, %v2905_v38 }
0x131e   : > { %v2912_v55 = vmul.f32 %v2904_v15, %v2848_v30  ;;  %v2915_v22 = vpack.c.bf16 %v2911_v11, %v2907_v10 }
0x131f   : > { %v2914_v9 = vpack.c.bf16 %v2910_v14, %v2906_v13 }
0x1320   : > { %v2916_v16 = vpack.c.bf16 %v2912_v55, %v2908_v12 }
0x1321   : > { %3212 = vmatprep.mubr.bf16.mxu0 %v2914_v9 }
0x1322   : > { %3253 = vmatprep.mubr.bf16.mxu1 %v2916_v16  ;;  %3213 = vmatmul.mubr.bf16.vlgmr.msra.gmra.mxu0 %v2913_v33 }
0x1323   : > { %3254 = vmatmul.mubr.bf16.vlgmr.msra.gmra.mxu1 %v2915_v22 }
0x13e2   : > { %v3894_v34 = vpop.f32.mrf.mxu0 }
0x13e3   : > { %v3916_v37 = vpop.f32.mrf.mxu1 }
0x13e4   : > { %v3895_v41 = vpop.f32.mrf.mxu0 }
0x13e5   : > { %v3896_v7 = vadd.f32 %v3895_v41, %v3894_v34  ;;  %v3917_v8 = vpop.f32.mrf.mxu1 }
0x13e6   : > { %v3897_v39 = vpop.f32.mrf.mxu0  ;;  %v3918_v5 = vadd.f32 %v3917_v8, %v3916_v37 }
0x13e7   : > { %v3215_v42 = vadd.f32 %v3896_v7, %v3648_v63  ;;  %v3919_v43 = vpop.f32.mrf.mxu1 }
0x13e8   : > { %v3898_v44 = vpop.f32.mrf.mxu0 }
0x13e9   : > { %v3256_v57 = vadd.f32 %v3918_v5, %v3215_v42  ;;  %v3899_v36 = vadd.f32 %v3898_v44, %v3897_v39  ;;  %v3920_v32 = vpop.f32.mrf.mxu1 }
0x13ea   : > { %v3921_v4 = vadd.f32 %v3920_v32, %v3919_v43 }
0x13eb   : > { %v3266_v60 = vmul.f32 %v3265_v6, %v3256_v57  ;;  %v3218_v3 = vadd.f32 %v3899_v36, %v3648_v63 }
0x13ed   : > { %v3268_v45 = vadd.f32 %v3266_v60, %v5796_v56  ;;  %v3259_v17 = vadd.f32 %v3921_v4, %v3218_v3 }
0x13ef   : > { %3270 = vst [vmem:[%s5408_s20] sm:$0xff] %v3268_v45  ;;  %v3267_v0 = vmul.f32 %v3265_v6, %v3259_v17 }
0x13f1   : > { %v3269_v51 = vadd.f32 %v3267_v0, %v5801_v24 }
0x13f3   : > { %3271 = vst [vmem:[%s5408_s20 + $0x8] sm:$0xff] %v3269_v51 }
0x13f4   : > { %4835 = shalt.err (!%p4832_p5)
}
0x13f5   : > { %s4836_s21 = scalar_lea.hbm %s5878_s30, 256  ;;  %s4840_s24 = scalar_lea.hbm %s6050_s15, 1024 }
0x13f6   : > { %p4837_p6 = scmp.ne.s32.totalorder %s5878_s30, %s4836_s21  ;;  %p4841_p9 = scmp.lt.s32.totalorder %s5878_s30, %s6050_s15 }
0x13f7   : > { %p4842_p11 = scmp.lt.s32.totalorder %s4840_s24, %s4836_s21 }
0x13f8   : > { %p4838_p4 = pnand %p4837_p6, %p6051_p8 }
0x13f9   : > { %p4843_p12 = por %p4842_p11, %p4841_p9 }
0x13fa   : > { %p4839_p2 = pneg %p4838_p4 }
0x13fc   : > { %p4844_p13 = pnand %p4843_p12, %p4839_p2 }
0x13fe   : > { %4847 = shalt.err (!%p4844_p13)
}
0x13ff   : > { %s4988_s16 = smov 128   ;;  %s4989_s12 = smov 8  }
0x1400   : > { %4226 = dma.vmem_to_hbm [thread:$0]  (%p6051_p8), %s5872_s14, 256, %s5878_s30, %s5883_s8, %s4988_s16, %s4988_s16, %s4989_s12  }
0x1401 PF: > { %s6052_s6 = sld [smem:[#allocation28_spill]]  ;;  %p4276_p1 = scmp.ge.s32.totalorder %s4962_s1, 2 }
0x1402   : > { %s6053_s9 = sld [smem:[#allocation35_spill]] }
0x1407   : > { %s3303_s11 = sand.u32 1, %s6052_s6  }
0x1408   : > { %p6054_p0 = scmp.ne.s32.totalorder %s6053_s9, 0  ;;  %s3304_s17 = scalar_lea.sflag [#allocation7], %s3303_s11 }
0x140a   : > { %p4258_p3 = pnand %p4276_p1, %p6054_p0 }
0x140c   : > { %p4259_p7 = pneg %p4258_p3 }
0x140e   : > { %4917 = dma.done.wait (%p4259_p7), %s3304_s17, 256  }
0x140f   : > { %4919 = vsyncadd (%p4259_p7), %s3304_s17, 4294967040  ;;  %s39_s1 = sadd.s32 1, %s4962_s1   ;;  %s6055_s5 = smov %s5304_s27 }
0x1410   : > { %p36_p10 = scmp.ge.s32.totalorder %s39_s1, 6   ;;  %s6056_s14 = sld [smem:[#allocation31_spill]] }
0x1411   : > { %s6057_s13 = sld [smem:[#allocation34_spill]]  ;;  %s6058_s24 = smov %s4926_s25 }
0x1412   : > { %s6059_s25 = smov %s4930_s26  ;;  %s6060_s26 = smov %s5307_s3 }
0x1413   : > { %s6061_s27 = smov %s4938_s28  ;;  %s6062_s28 = smov %s4942_s29 }
0x1414   : > { %s6063_s29 = smov %s6055_s5  ;;  %s6064_s0 = smov %s4954_s18 }
0x1415   : > { %s6065_s30 = smov %s4958_s19  ;;  %38 = sbr.rel (!%p36_p10) target bundleno = 33 (0x21), region = 185 }
0x1416   : > { %s6066_s18 = smov %s6056_s14 }
0x1417   : > { %s6067_s19 = smov %s6057_s13 }
0x141a   :  { %3309 = vsyncpa [#allocation6], 1 }
0x141b   :  { %3311 = vsyncpa [#allocation6 + $0x1], 1 }
0x141c   :  { %3312 = vsyncpa [#allocation9], 1 }
0x141d   :  { %3314 = vsyncpa [#allocation9 + $0x1], 1 }
0x141e   :  { %3315 = vsyncpa [#allocation12], 1 }
0x141f   :  { %3316 = vsyncpa [#allocation15], 1 }
0x1420   :  { %3317 = vsyncpa [#allocation18], 1 }
0x1421   :  { %3318 = vsyncpa [#allocation7], 1 }
0x1422   :  { %3320 = vsyncpa [#allocation7 + $0x1], 1 }

</bundles_post_ra>
